<compile_context>
chip_gen: v5e
topology: v5e:2x2
jax: 0.10.0
libtpu: 0.0.40
codegen_flags: <defaults>
</compile_context>

<pallas_src>
import functools

import numpy as np

import jax
import jax.numpy as jnp
from jax import lax
from jax.experimental import pallas as pl
from jax.experimental.pallas import tpu as pltpu

NEG_SLOPE = 0.01  # nn.LeakyReLU default negative_slope


def _leaky(t):
    return jnp.where(t > 0, t, NEG_SLOPE * t)


# --------------------------- host-side helpers ------------------------------

def build_tap_masks(tile_B, H, W):
    """(9, 1, tile_B*HW) 0/1 masks: tap t valid iff (y+dy, x+dx) stays inside
    the image.  Handles both zero padding and cross-image (batch) boundaries.
    Built with numpy at trace time -> a tiny constant input."""
    HW = H * W
    p = np.arange(HW)
    y, x = p // W, p % W
    masks = np.zeros((9, 1, tile_B * HW), np.float32)
    t = 0
    for dy in (-1, 0, 1):
        for dx in (-1, 0, 1):
            valid = ((y + dy >= 0) & (y + dy < H) &
                     (x + dx >= 0) & (x + dx < W)).astype(np.float32)
            masks[t, 0, :] = np.tile(valid, tile_B)
            t += 1
    return jnp.asarray(masks)


# ------------------------------ fused kernel --------------------------------

def _fused_kernel(x_ref, mask_ref, wc_ref, bc_ref, wres_ref, bres_ref,
                  wv_ref, bv_ref, w1_ref, b1_ref, w2_ref, b2_ref, o_ref,
                  *, H, W, C, F, res_layers, tile_B):
    HW = H * W
    Mt = tile_B * HW
    offs = tuple(dy * W + dx for dy in (-1, 0, 1) for dx in (-1, 0, 1))

    def shift_lanes(a, off):
        # a: (rows, Mt); result[:, m] = a[:, m + off], zero-filled at the ends.
        if off == 0:
            return a
        rows = a.shape[0]
        pad = jnp.zeros((rows, abs(off)), a.dtype)
        if off > 0:
            return jnp.concatenate([a[:, off:], pad], axis=1)
        return jnp.concatenate([pad, a[:, :off]], axis=1)

    def build_col(a):
        # a: (rows, Mt) f32 -> (9*rows, Mt) bf16, tap-major rows, zero-padded
        # 3x3 neighborhood realized with lane shifts + boundary masks.
        parts = [shift_lanes(a, offs[t]) * mask_ref[t] for t in range(9)]
        return jnp.concatenate(parts, axis=0).astype(jnp.bfloat16)

    def conv3x3(a, w, b):
        # w: (Cout, 9*Cin) bf16 (tap-major columns), b: (Cout, 1) f32.
        return jnp.dot(w, build_col(a),
                       preferred_element_type=jnp.float32) + b

    # --- ConvBlock: 3x3 conv (Cin=1) + LeakyReLU ------------------------------
    x_row = x_ref[...]                                   # (1, Mt) f32
    a = _leaky(conv3x3(x_row, wc_ref[...], bc_ref[...]))  # (C, Mt) f32

    # --- ResBlocks: LeakyReLU(conv2(LeakyReLU(conv1(a))) + a) -----------------
    def layer_body(l, a):
        h = _leaky(conv3x3(a, wres_ref[2 * l], bres_ref[2 * l]))
        return _leaky(conv3x3(h, wres_ref[2 * l + 1], bres_ref[2 * l + 1]) + a)

    a = lax.fori_loop(0, res_layers, layer_body, a)

    # --- ValueBlock: 1x1 conv + LeakyReLU -> linear1 -> LeakyReLU -> linear2 --
    v = _leaky(jnp.dot(wv_ref[...], a.astype(jnp.bfloat16),
                       preferred_element_type=jnp.float32) + bv_ref[...])  # (F, Mt)

    rows = []
    for b in range(tile_B):
        hid = b1_ref[...]                                  # (1, nh) f32
        for f in range(F):
            # PyTorch NCHW flatten order (f, y, x) is handled by the host-side
            # permutation of w1 to (F, HW, nh) -> per-f MXU dots, no transpose.
            seg = v[f:f + 1, b * HW:(b + 1) * HW].astype(jnp.bfloat16)  # (1, HW)
            hid = hid + jnp.dot(seg, w1_ref[f],
                                preferred_element_type=jnp.float32)
        hid = _leaky(hid)
        rows.append(jnp.sum(hid * w2_ref[...], axis=1, keepdims=True)
                    + b2_ref[...])                         # (1, 1)
    out = rows[0] if tile_B == 1 else jnp.concatenate(rows, axis=0)
    o_ref[...] = out.astype(o_ref.dtype)


# ------------------------------ forward wrapper ------------------------------

def azdqn_forward(params, x, *, H, W, batch_tile=1):
    """x: (B, H, W) board -> value: (B, 1).  Mirrors AZDQNResNet.forward."""
    B = x.shape[0]
    assert B % batch_tile == 0, "batch must be divisible by batch_tile"
    n_tiles = B // batch_tile
    HW = H * W
    tile_M = batch_tile * HW

    C = params["wres"].shape[1]
    F = params["wv"].shape[0]
    res_layers = params["wres"].shape[0] // 2

    # (B, H, W) -> (n_tiles, 1, tile_M) with lane index m = b_local*HW + y*W + x.
    x_in = x.astype(jnp.float32).reshape(n_tiles, 1, tile_M)
    tapmask = build_tap_masks(batch_tile, H, W)          # (9, 1, tile_M), tiny

    kernel = functools.partial(_fused_kernel, H=H, W=W, C=C, F=F,
                               res_layers=res_layers, tile_B=batch_tile)

    def full_spec(arr):
        nd = arr.ndim
        return pl.BlockSpec(arr.shape, lambda i, _nd=nd: (0,) * _nd)

    args = (x_in, tapmask, params["wc"], params["bc"],
            params["wres"], params["bres"], params["wv"], params["bv"],
            params["w1"], params["b1"], params["w2"], params["b2"])

    in_specs = [pl.BlockSpec((None, 1, tile_M), lambda i: (i, 0, 0))]  # x
    in_specs += [full_spec(a) for a in args[1:]]                        # consts
    out_spec = pl.BlockSpec((None, batch_tile, 1), lambda i: (i, 0, 0))

    total_in_bytes = sum(int(a.size) * a.dtype.itemsize for a in args)
    vmem_limit = int(min(56 * 2**20, max(16 * 2**20, 4 * total_in_bytes + (4 << 20))))

    out = pl.pallas_call(
        kernel,
        grid=(n_tiles,),
        out_shape=jax.ShapeDtypeStruct((n_tiles, batch_tile, 1), jnp.float32),
        in_specs=in_specs,
        out_specs=out_spec,
        compiler_params=pltpu.CompilerParams(
            dimension_semantics=("parallel",),
            vmem_limit_bytes=vmem_limit),
    )(*args)
    return out.reshape(B, 1)


# ------------------------------ parameter init -------------------------------

def init_params(key, *, res_filters, res_layers, head_filters, H, W,
                num_hidden=256):
    """Synthetic params generated in PyTorch layouts, then permuted/cast to the
    kernel layouts (documents how real nn.Module weights would be ported)."""
    C, F, HW = res_filters, head_filters, H * W

    def nxt():
        nonlocal key
        key, sub = jax.random.split(key)
        return sub

    def conv3x3_w(cin, cout):
        # PyTorch nn.Conv2d weight (cout, cin, 3, 3) -> kernel (cout, 9*cin),
        # columns tap-major ((ky,kx) row-major) then cin; bf16 for the MXU.
        w_pt = jax.random.normal(nxt(), (cout, cin, 3, 3), jnp.float32) \
            / float(np.sqrt(9.0 * cin))
        b_pt = jax.random.normal(nxt(), (cout,), jnp.float32) * 0.01
        w_k = jnp.transpose(w_pt, (0, 2, 3, 1)).reshape(cout, 9 * cin)
        return w_k.astype(jnp.bfloat16), b_pt.reshape(cout, 1)

    params = {}

    # ConvBlock(1, C)
    params["wc"], params["bc"] = conv3x3_w(1, C)          # (C, 9) bf16, (C, 1)

    # res_layers x ResBlock(C): two 3x3 convs each, stacked.
    ws, bs = [], []
    for _ in range(res_layers):
        for _ in range(2):
            w, b = conv3x3_w(C, C)
            ws.append(w)
            bs.append(b)
    params["wres"] = jnp.stack(ws)                        # (2L, C, 9C) bf16
    params["bres"] = jnp.stack(bs)                        # (2L, C, 1) f32

    # ValueBlock 1x1 conv: PyTorch (F, C, 1, 1) -> (F, C).
    wv_pt = jax.random.normal(nxt(), (F, C, 1, 1), jnp.float32) / float(np.sqrt(C))
    params["wv"] = wv_pt[:, :, 0, 0].astype(jnp.bfloat16)
    params["bv"] = (jax.random.normal(nxt(), (F,), jnp.float32) * 0.01).reshape(F, 1)

    # linear1: PyTorch weight (nh, F*HW) over the NCHW flatten ((f,y,x)-major).
    # Kernel layout (F, HW, nh): w1[f, p, n] = w1_pt[n, f*HW + p].
    w1_pt = jax.random.normal(nxt(), (num_hidden, F * HW), jnp.float32) \
        / float(np.sqrt(F * HW))
    params["w1"] = w1_pt.T.reshape(F, HW, num_hidden).astype(jnp.bfloat16)
    params["b1"] = (jax.random.normal(nxt(), (num_hidden,), jnp.float32) * 0.01) \
        .reshape(1, num_hidden)

    # linear2: PyTorch weight (1, nh) used as a row for a lane reduction.
    params["w2"] = jax.random.normal(nxt(), (1, num_hidden), jnp.float32) \
        / float(np.sqrt(num_hidden))
    params["b2"] = (jax.random.normal(nxt(), (1,), jnp.float32) * 0.01).reshape(1, 1)
    return params


if __name__ == "__main__":
    key = jax.random.PRNGKey(0)
    # state_dims = (6, 8): H must be 6 so H*W == prod(state_dims[1:]) * 6,
    # matching ValueBlock's Linear(state_size * head_filters * 6, ...) sizing.
    state_dims = (6, 8)
    H, W = state_dims
    batch = 2
    res_filters, res_layers, head_filters = 32, 2, 8  # small config of the module

    k_params, k_x = jax.random.split(key)
    params = init_params(k_params, res_filters=res_filters, res_layers=res_layers,
                         head_filters=head_filters, H=H, W=W)
    x = jax.random.normal(k_x, (batch, H, W), jnp.float32)

    fwd = jax.jit(functools.partial(azdqn_forward, H=H, W=W, batch_tile=1))
    value = jax.block_until_ready(fwd(params, x))

    assert value.shape == (batch, 1) and value.dtype == jnp.float32
    assert bool(jnp.all(jnp.isfinite(value)))
    # TODO(synk): for large batches, raise batch_tile so tile_B*HW fills the
    # 128-lane vregs / MXU M dim (e.g. batch_tile=8 -> 384 lanes per step).
    print("KERNEL_OK")
</pallas_src>

<mosaic_0001>
module attributes {stable_mosaic.version = 11 : i64} {
  func.func @_fused_kernel(%arg0: i32, %arg1: memref<1x1x48xf32, #tpu.memory_space<vmem>>, %arg2: memref<9x1x48xf32, #tpu.memory_space<vmem>>, %arg3: memref<32x9xbf16, #tpu.memory_space<vmem>>, %arg4: memref<32x1xf32, #tpu.memory_space<vmem>>, %arg5: memref<4x32x288xbf16, #tpu.memory_space<vmem>>, %arg6: memref<4x32x1xf32, #tpu.memory_space<vmem>>, %arg7: memref<8x32xbf16, #tpu.memory_space<vmem>>, %arg8: memref<8x1xf32, #tpu.memory_space<vmem>>, %arg9: memref<8x48x256xbf16, #tpu.memory_space<vmem>>, %arg10: memref<1x256xf32, #tpu.memory_space<vmem>>, %arg11: memref<1x256xf32, #tpu.memory_space<vmem>>, %arg12: memref<1x1xf32, #tpu.memory_space<vmem>>, %arg13: memref<1x1x1xf32, #tpu.memory_space<vmem>>) attributes {dimension_semantics = [#tpu.dimension_semantics<parallel>], iteration_bounds = array<i64: 2>, scalar_prefetch = 0 : i64, scratch_operands = 0 : i64, tpu.core_type = #tpu.core_type<tc>, window_params = [{transform_indices = @transform_0, window_bounds = array<i64: 1, 1, 48>}, {pipeline_mode = #tpu.pipeline_mode<synchronous>, transform_indices = @transform_1, window_bounds = array<i64: 9, 1, 48>}, {pipeline_mode = #tpu.pipeline_mode<synchronous>, transform_indices = @transform_2, window_bounds = array<i64: 32, 9>}, {pipeline_mode = #tpu.pipeline_mode<synchronous>, transform_indices = @transform_3, window_bounds = array<i64: 32, 1>}, {pipeline_mode = #tpu.pipeline_mode<synchronous>, transform_indices = @transform_4, window_bounds = array<i64: 4, 32, 288>}, {pipeline_mode = #tpu.pipeline_mode<synchronous>, transform_indices = @transform_5, window_bounds = array<i64: 4, 32, 1>}, {pipeline_mode = #tpu.pipeline_mode<synchronous>, transform_indices = @transform_6, window_bounds = array<i64: 8, 32>}, {pipeline_mode = #tpu.pipeline_mode<synchronous>, transform_indices = @transform_7, window_bounds = array<i64: 8, 1>}, {pipeline_mode = #tpu.pipeline_mode<synchronous>, transform_indices = @transform_8, window_bounds = array<i64: 8, 48, 256>}, {pipeline_mode = #tpu.pipeline_mode<synchronous>, transform_indices = @transform_9, window_bounds = array<i64: 1, 256>}, {pipeline_mode = #tpu.pipeline_mode<synchronous>, transform_indices = @transform_10, window_bounds = array<i64: 1, 256>}, {pipeline_mode = #tpu.pipeline_mode<synchronous>, transform_indices = @transform_11, window_bounds = array<i64: 1, 1>}, {transform_indices = @transform_12, window_bounds = array<i64: 1, 1, 1>}]} {
    %c0 = arith.constant 0 : index
    %c0_0 = arith.constant 0 : index
    %c0_1 = arith.constant 0 : index
    %0 = vector.load %arg1[%c0, %c0_0, %c0_1] : memref<1x1x48xf32, #tpu.memory_space<vmem>>, vector<1x1x48xf32>
    %1 = vector.shape_cast %0 : vector<1x1x48xf32> to vector<1x48xf32>
    %c0_2 = arith.constant 0 : index
    %c0_3 = arith.constant 0 : index
    %2 = vector.load %arg3[%c0_2, %c0_3] : memref<32x9xbf16, #tpu.memory_space<vmem>>, vector<32x9xbf16>
    %c0_4 = arith.constant 0 : index
    %c0_5 = arith.constant 0 : index
    %3 = vector.load %arg4[%c0_4, %c0_5] : memref<32x1xf32, #tpu.memory_space<vmem>>, vector<32x1xf32>
    %cst = arith.constant 0.000000e+00 : f32
    %4 = vector.broadcast %cst : f32 to vector<1x9xf32>
    %5 = vector.extract_strided_slice %1 {offsets = [0, 0], sizes = [1, 39], strides = [1, 1]} : vector<1x48xf32> to vector<1x39xf32>
    %6 = tpu.concatenate %4, %5 in 1 : vector<1x9xf32>, vector<1x39xf32> -> vector<1x48xf32>
    %c0_6 = arith.constant 0 : index
    %c0_7 = arith.constant 0 : index
    %c0_8 = arith.constant 0 : index
    %7 = vector.load %arg2[%c0_6, %c0_7, %c0_8] : memref<9x1x48xf32, #tpu.memory_space<vmem>>, vector<1x1x48xf32>
    %8 = vector.shape_cast %7 : vector<1x1x48xf32> to vector<1x48xf32>
    %9 = arith.mulf %6, %8 : vector<1x48xf32>
    %cst_9 = arith.constant 0.000000e+00 : f32
    %10 = vector.broadcast %cst_9 : f32 to vector<1x8xf32>
    %11 = vector.extract_strided_slice %1 {offsets = [0, 0], sizes = [1, 40], strides = [1, 1]} : vector<1x48xf32> to vector<1x40xf32>
    %12 = tpu.concatenate %10, %11 in 1 : vector<1x8xf32>, vector<1x40xf32> -> vector<1x48xf32>
    %c1 = arith.constant 1 : index
    %c0_10 = arith.constant 0 : index
    %c0_11 = arith.constant 0 : index
    %13 = vector.load %arg2[%c1, %c0_10, %c0_11] : memref<9x1x48xf32, #tpu.memory_space<vmem>>, vector<1x1x48xf32>
    %14 = vector.shape_cast %13 : vector<1x1x48xf32> to vector<1x48xf32>
    %15 = arith.mulf %12, %14 : vector<1x48xf32>
    %cst_12 = arith.constant 0.000000e+00 : f32
    %16 = vector.broadcast %cst_12 : f32 to vector<1x7xf32>
    %17 = vector.extract_strided_slice %1 {offsets = [0, 0], sizes = [1, 41], strides = [1, 1]} : vector<1x48xf32> to vector<1x41xf32>
    %18 = tpu.concatenate %16, %17 in 1 : vector<1x7xf32>, vector<1x41xf32> -> vector<1x48xf32>
    %c2 = arith.constant 2 : index
    %c0_13 = arith.constant 0 : index
    %c0_14 = arith.constant 0 : index
    %19 = vector.load %arg2[%c2, %c0_13, %c0_14] : memref<9x1x48xf32, #tpu.memory_space<vmem>>, vector<1x1x48xf32>
    %20 = vector.shape_cast %19 : vector<1x1x48xf32> to vector<1x48xf32>
    %21 = arith.mulf %18, %20 : vector<1x48xf32>
    %cst_15 = arith.constant 0.000000e+00 : f32
    %22 = vector.broadcast %cst_15 : f32 to vector<1x1xf32>
    %23 = vector.extract_strided_slice %1 {offsets = [0, 0], sizes = [1, 47], strides = [1, 1]} : vector<1x48xf32> to vector<1x47xf32>
    %24 = tpu.concatenate %22, %23 in 1 : vector<1x1xf32>, vector<1x47xf32> -> vector<1x48xf32>
    %c3 = arith.constant 3 : index
    %c0_16 = arith.constant 0 : index
    %c0_17 = arith.constant 0 : index
    %25 = vector.load %arg2[%c3, %c0_16, %c0_17] : memref<9x1x48xf32, #tpu.memory_space<vmem>>, vector<1x1x48xf32>
    %26 = vector.shape_cast %25 : vector<1x1x48xf32> to vector<1x48xf32>
    %27 = arith.mulf %24, %26 : vector<1x48xf32>
    %c4 = arith.constant 4 : index
    %c0_18 = arith.constant 0 : index
    %c0_19 = arith.constant 0 : index
    %28 = vector.load %arg2[%c4, %c0_18, %c0_19] : memref<9x1x48xf32, #tpu.memory_space<vmem>>, vector<1x1x48xf32>
    %29 = vector.shape_cast %28 : vector<1x1x48xf32> to vector<1x48xf32>
    %30 = arith.mulf %1, %29 : vector<1x48xf32>
    %cst_20 = arith.constant 0.000000e+00 : f32
    %31 = vector.broadcast %cst_20 : f32 to vector<1x1xf32>
    %32 = vector.extract_strided_slice %1 {offsets = [0, 1], sizes = [1, 47], strides = [1, 1]} : vector<1x48xf32> to vector<1x47xf32>
    %33 = tpu.concatenate %32, %31 in 1 : vector<1x47xf32>, vector<1x1xf32> -> vector<1x48xf32>
    %c5 = arith.constant 5 : index
    %c0_21 = arith.constant 0 : index
    %c0_22 = arith.constant 0 : index
    %34 = vector.load %arg2[%c5, %c0_21, %c0_22] : memref<9x1x48xf32, #tpu.memory_space<vmem>>, vector<1x1x48xf32>
    %35 = vector.shape_cast %34 : vector<1x1x48xf32> to vector<1x48xf32>
    %36 = arith.mulf %33, %35 : vector<1x48xf32>
    %cst_23 = arith.constant 0.000000e+00 : f32
    %37 = vector.broadcast %cst_23 : f32 to vector<1x7xf32>
    %38 = vector.extract_strided_slice %1 {offsets = [0, 7], sizes = [1, 41], strides = [1, 1]} : vector<1x48xf32> to vector<1x41xf32>
    %39 = tpu.concatenate %38, %37 in 1 : vector<1x41xf32>, vector<1x7xf32> -> vector<1x48xf32>
    %c6 = arith.constant 6 : index
    %c0_24 = arith.constant 0 : index
    %c0_25 = arith.constant 0 : index
    %40 = vector.load %arg2[%c6, %c0_24, %c0_25] : memref<9x1x48xf32, #tpu.memory_space<vmem>>, vector<1x1x48xf32>
    %41 = vector.shape_cast %40 : vector<1x1x48xf32> to vector<1x48xf32>
    %42 = arith.mulf %39, %41 : vector<1x48xf32>
    %cst_26 = arith.constant 0.000000e+00 : f32
    %43 = vector.broadcast %cst_26 : f32 to vector<1x8xf32>
    %44 = vector.extract_strided_slice %1 {offsets = [0, 8], sizes = [1, 40], strides = [1, 1]} : vector<1x48xf32> to vector<1x40xf32>
    %45 = tpu.concatenate %44, %43 in 1 : vector<1x40xf32>, vector<1x8xf32> -> vector<1x48xf32>
    %c7 = arith.constant 7 : index
    %c0_27 = arith.constant 0 : index
    %c0_28 = arith.constant 0 : index
    %46 = vector.load %arg2[%c7, %c0_27, %c0_28] : memref<9x1x48xf32, #tpu.memory_space<vmem>>, vector<1x1x48xf32>
    %47 = vector.shape_cast %46 : vector<1x1x48xf32> to vector<1x48xf32>
    %48 = arith.mulf %45, %47 : vector<1x48xf32>
    %cst_29 = arith.constant 0.000000e+00 : f32
    %49 = vector.broadcast %cst_29 : f32 to vector<1x9xf32>
    %50 = vector.extract_strided_slice %1 {offsets = [0, 9], sizes = [1, 39], strides = [1, 1]} : vector<1x48xf32> to vector<1x39xf32>
    %51 = tpu.concatenate %50, %49 in 1 : vector<1x39xf32>, vector<1x9xf32> -> vector<1x48xf32>
    %c8 = arith.constant 8 : index
    %c0_30 = arith.constant 0 : index
    %c0_31 = arith.constant 0 : index
    %52 = vector.load %arg2[%c8, %c0_30, %c0_31] : memref<9x1x48xf32, #tpu.memory_space<vmem>>, vector<1x1x48xf32>
    %53 = vector.shape_cast %52 : vector<1x1x48xf32> to vector<1x48xf32>
    %54 = arith.mulf %51, %53 : vector<1x48xf32>
    %55 = tpu.concatenate %9, %15, %21, %27, %30, %36, %42, %48, %54 in 0 : vector<1x48xf32>, vector<1x48xf32>, vector<1x48xf32>, vector<1x48xf32>, vector<1x48xf32>, vector<1x48xf32>, vector<1x48xf32>, vector<1x48xf32>, vector<1x48xf32> -> vector<9x48xf32>
    %56 = arith.truncf %55 : vector<9x48xf32> to vector<9x48xbf16>
    %cst_32 = arith.constant dense<0.000000e+00> : vector<32x48xf32>
    %57 = tpu.matmul %2, %56, %cst_32 {dimension_numbers = #tpu.dot_dimension_numbers<[1], [0], [0], [1], [0, 0, 1, 1], [], []>} : vector<32x9xbf16>, vector<9x48xbf16>, vector<32x48xf32> -> vector<32x48xf32>
    %58 = vector.broadcast %3 : vector<32x1xf32> to vector<32x48xf32>
    %59 = arith.addf %57, %58 : vector<32x48xf32>
    %cst_33 = arith.constant 0.000000e+00 : f32
    %60 = vector.broadcast %cst_33 : f32 to vector<32x48xf32>
    %61 = arith.cmpf ogt, %59, %60 : vector<32x48xf32>
    %cst_34 = arith.constant 0.00999999977 : f32
    %62 = vector.broadcast %cst_34 : f32 to vector<32x48xf32>
    %63 = arith.mulf %62, %59 : vector<32x48xf32>
    %64 = arith.select %61, %59, %63 : vector<32x48xi1>, vector<32x48xf32>
    %c0_i32 = arith.constant 0 : i32
    %c2_i32 = arith.constant 2 : i32
    %65 = arith.addi %c0_i32, %c2_i32 : i32
    %c1_i32 = arith.constant 1 : i32
    %66 = scf.for %arg14 = %c0_i32 to %65 step %c1_i32 iter_args(%arg15 = %64) -> (vector<32x48xf32>)  : i32 {
      %c2_i32_87 = arith.constant 2 : i32
      %141 = arith.muli %c2_i32_87, %arg14 : i32
      %142 = arith.index_cast %141 : i32 to index
      %c0_88 = arith.constant 0 : index
      %c0_89 = arith.constant 0 : index
      %143 = vector.load %arg5[%142, %c0_88, %c0_89] : memref<4x32x288xbf16, #tpu.memory_space<vmem>>, vector<1x32x288xbf16>
      %144 = vector.shape_cast %143 : vector<1x32x288xbf16> to vector<32x288xbf16>
      %c2_i32_90 = arith.constant 2 : i32
      %145 = arith.muli %c2_i32_90, %arg14 : i32
      %146 = arith.index_cast %145 : i32 to index
      %c0_91 = arith.constant 0 : index
      %c0_92 = arith.constant 0 : index
      %147 = vector.load %arg6[%146, %c0_91, %c0_92] : memref<4x32x1xf32, #tpu.memory_space<vmem>>, vector<1x32x1xf32>
      %148 = vector.shape_cast %147 : vector<1x32x1xf32> to vector<32x1xf32>
      %cst_93 = arith.constant 0.000000e+00 : f32
      %149 = vector.broadcast %cst_93 : f32 to vector<32x9xf32>
      %150 = vector.extract_strided_slice %arg15 {offsets = [0, 0], sizes = [32, 39], strides = [1, 1]} : vector<32x48xf32> to vector<32x39xf32>
      %151 = tpu.concatenate %149, %150 in 1 : vector<32x9xf32>, vector<32x39xf32> -> vector<32x48xf32>
      %c0_94 = arith.constant 0 : index
      %c0_95 = arith.constant 0 : index
      %c0_96 = arith.constant 0 : index
      %152 = vector.load %arg2[%c0_94, %c0_95, %c0_96] : memref<9x1x48xf32, #tpu.memory_space<vmem>>, vector<1x1x48xf32>
      %153 = vector.shape_cast %152 : vector<1x1x48xf32> to vector<1x48xf32>
      %154 = vector.broadcast %153 : vector<1x48xf32> to vector<32x48xf32>
      %155 = arith.mulf %151, %154 : vector<32x48xf32>
      %cst_97 = arith.constant 0.000000e+00 : f32
      %156 = vector.broadcast %cst_97 : f32 to vector<32x8xf32>
      %157 = vector.extract_strided_slice %arg15 {offsets = [0, 0], sizes = [32, 40], strides = [1, 1]} : vector<32x48xf32> to vector<32x40xf32>
      %158 = tpu.concatenate %156, %157 in 1 : vector<32x8xf32>, vector<32x40xf32> -> vector<32x48xf32>
      %c1_98 = arith.constant 1 : index
      %c0_99 = arith.constant 0 : index
      %c0_100 = arith.constant 0 : index
      %159 = vector.load %arg2[%c1_98, %c0_99, %c0_100] : memref<9x1x48xf32, #tpu.memory_space<vmem>>, vector<1x1x48xf32>
      %160 = vector.shape_cast %159 : vector<1x1x48xf32> to vector<1x48xf32>
      %161 = vector.broadcast %160 : vector<1x48xf32> to vector<32x48xf32>
      %162 = arith.mulf %158, %161 : vector<32x48xf32>
      %cst_101 = arith.constant 0.000000e+00 : f32
      %163 = vector.broadcast %cst_101 : f32 to vector<32x7xf32>
      %164 = vector.extract_strided_slice %arg15 {offsets = [0, 0], sizes = [32, 41], strides = [1, 1]} : vector<32x48xf32> to vector<32x41xf32>
      %165 = tpu.concatenate %163, %164 in 1 : vector<32x7xf32>, vector<32x41xf32> -> vector<32x48xf32>
      %c2_102 = arith.constant 2 : index
      %c0_103 = arith.constant 0 : index
      %c0_104 = arith.constant 0 : index
      %166 = vector.load %arg2[%c2_102, %c0_103, %c0_104] : memref<9x1x48xf32, #tpu.memory_space<vmem>>, vector<1x1x48xf32>
      %167 = vector.shape_cast %166 : vector<1x1x48xf32> to vector<1x48xf32>
      %168 = vector.broadcast %167 : vector<1x48xf32> to vector<32x48xf32>
      %169 = arith.mulf %165, %168 : vector<32x48xf32>
      %cst_105 = arith.constant 0.000000e+00 : f32
      %170 = vector.broadcast %cst_105 : f32 to vector<32x1xf32>
      %171 = vector.extract_strided_slice %arg15 {offsets = [0, 0], sizes = [32, 47], strides = [1, 1]} : vector<32x48xf32> to vector<32x47xf32>
      %172 = tpu.concatenate %170, %171 in 1 : vector<32x1xf32>, vector<32x47xf32> -> vector<32x48xf32>
      %c3_106 = arith.constant 3 : index
      %c0_107 = arith.constant 0 : index
      %c0_108 = arith.constant 0 : index
      %173 = vector.load %arg2[%c3_106, %c0_107, %c0_108] : memref<9x1x48xf32, #tpu.memory_space<vmem>>, vector<1x1x48xf32>
      %174 = vector.shape_cast %173 : vector<1x1x48xf32> to vector<1x48xf32>
      %175 = vector.broadcast %174 : vector<1x48xf32> to vector<32x48xf32>
      %176 = arith.mulf %172, %175 : vector<32x48xf32>
      %c4_109 = arith.constant 4 : index
      %c0_110 = arith.constant 0 : index
      %c0_111 = arith.constant 0 : index
      %177 = vector.load %arg2[%c4_109, %c0_110, %c0_111] : memref<9x1x48xf32, #tpu.memory_space<vmem>>, vector<1x1x48xf32>
      %178 = vector.shape_cast %177 : vector<1x1x48xf32> to vector<1x48xf32>
      %179 = vector.broadcast %178 : vector<1x48xf32> to vector<32x48xf32>
      %180 = arith.mulf %arg15, %179 : vector<32x48xf32>
      %cst_112 = arith.constant 0.000000e+00 : f32
      %181 = vector.broadcast %cst_112 : f32 to vector<32x1xf32>
      %182 = vector.extract_strided_slice %arg15 {offsets = [0, 1], sizes = [32, 47], strides = [1, 1]} : vector<32x48xf32> to vector<32x47xf32>
      %183 = tpu.concatenate %182, %181 in 1 : vector<32x47xf32>, vector<32x1xf32> -> vector<32x48xf32>
      %c5_113 = arith.constant 5 : index
      %c0_114 = arith.constant 0 : index
      %c0_115 = arith.constant 0 : index
      %184 = vector.load %arg2[%c5_113, %c0_114, %c0_115] : memref<9x1x48xf32, #tpu.memory_space<vmem>>, vector<1x1x48xf32>
      %185 = vector.shape_cast %184 : vector<1x1x48xf32> to vector<1x48xf32>
      %186 = vector.broadcast %185 : vector<1x48xf32> to vector<32x48xf32>
      %187 = arith.mulf %183, %186 : vector<32x48xf32>
      %cst_116 = arith.constant 0.000000e+00 : f32
      %188 = vector.broadcast %cst_116 : f32 to vector<32x7xf32>
      %189 = vector.extract_strided_slice %arg15 {offsets = [0, 7], sizes = [32, 41], strides = [1, 1]} : vector<32x48xf32> to vector<32x41xf32>
      %190 = tpu.concatenate %189, %188 in 1 : vector<32x41xf32>, vector<32x7xf32> -> vector<32x48xf32>
      %c6_117 = arith.constant 6 : index
      %c0_118 = arith.constant 0 : index
      %c0_119 = arith.constant 0 : index
      %191 = vector.load %arg2[%c6_117, %c0_118, %c0_119] : memref<9x1x48xf32, #tpu.memory_space<vmem>>, vector<1x1x48xf32>
      %192 = vector.shape_cast %191 : vector<1x1x48xf32> to vector<1x48xf32>
      %193 = vector.broadcast %192 : vector<1x48xf32> to vector<32x48xf32>
      %194 = arith.mulf %190, %193 : vector<32x48xf32>
      %cst_120 = arith.constant 0.000000e+00 : f32
      %195 = vector.broadcast %cst_120 : f32 to vector<32x8xf32>
      %196 = vector.extract_strided_slice %arg15 {offsets = [0, 8], sizes = [32, 40], strides = [1, 1]} : vector<32x48xf32> to vector<32x40xf32>
      %197 = tpu.concatenate %196, %195 in 1 : vector<32x40xf32>, vector<32x8xf32> -> vector<32x48xf32>
      %c7_121 = arith.constant 7 : index
      %c0_122 = arith.constant 0 : index
      %c0_123 = arith.constant 0 : index
      %198 = vector.load %arg2[%c7_121, %c0_122, %c0_123] : memref<9x1x48xf32, #tpu.memory_space<vmem>>, vector<1x1x48xf32>
      %199 = vector.shape_cast %198 : vector<1x1x48xf32> to vector<1x48xf32>
      %200 = vector.broadcast %199 : vector<1x48xf32> to vector<32x48xf32>
      %201 = arith.mulf %197, %200 : vector<32x48xf32>
      %cst_124 = arith.constant 0.000000e+00 : f32
      %202 = vector.broadcast %cst_124 : f32 to vector<32x9xf32>
      %203 = vector.extract_strided_slice %arg15 {offsets = [0, 9], sizes = [32, 39], strides = [1, 1]} : vector<32x48xf32> to vector<32x39xf32>
      %204 = tpu.concatenate %203, %202 in 1 : vector<32x39xf32>, vector<32x9xf32> -> vector<32x48xf32>
      %c8_125 = arith.constant 8 : index
      %c0_126 = arith.constant 0 : index
      %c0_127 = arith.constant 0 : index
      %205 = vector.load %arg2[%c8_125, %c0_126, %c0_127] : memref<9x1x48xf32, #tpu.memory_space<vmem>>, vector<1x1x48xf32>
      %206 = vector.shape_cast %205 : vector<1x1x48xf32> to vector<1x48xf32>
      %207 = vector.broadcast %206 : vector<1x48xf32> to vector<32x48xf32>
      %208 = arith.mulf %204, %207 : vector<32x48xf32>
      %209 = tpu.concatenate %155, %162, %169, %176, %180, %187, %194, %201, %208 in 0 : vector<32x48xf32>, vector<32x48xf32>, vector<32x48xf32>, vector<32x48xf32>, vector<32x48xf32>, vector<32x48xf32>, vector<32x48xf32>, vector<32x48xf32>, vector<32x48xf32> -> vector<288x48xf32>
      %210 = arith.truncf %209 : vector<288x48xf32> to vector<288x48xbf16>
      %cst_128 = arith.constant dense<0.000000e+00> : vector<32x48xf32>
      %211 = tpu.matmul %144, %210, %cst_128 {dimension_numbers = #tpu.dot_dimension_numbers<[1], [0], [0], [1], [0, 0, 1, 1], [], []>} : vector<32x288xbf16>, vector<288x48xbf16>, vector<32x48xf32> -> vector<32x48xf32>
      %212 = vector.broadcast %148 : vector<32x1xf32> to vector<32x48xf32>
      %213 = arith.addf %211, %212 : vector<32x48xf32>
      %cst_129 = arith.constant 0.000000e+00 : f32
      %214 = vector.broadcast %cst_129 : f32 to vector<32x48xf32>
      %215 = arith.cmpf ogt, %213, %214 : vector<32x48xf32>
      %cst_130 = arith.constant 0.00999999977 : f32
      %216 = vector.broadcast %cst_130 : f32 to vector<32x48xf32>
      %217 = arith.mulf %216, %213 : vector<32x48xf32>
      %218 = arith.select %215, %213, %217 : vector<32x48xi1>, vector<32x48xf32>
      %c2_i32_131 = arith.constant 2 : i32
      %219 = arith.muli %c2_i32_131, %arg14 : i32
      %c1_i32_132 = arith.constant 1 : i32
      %220 = arith.addi %219, %c1_i32_132 : i32
      %221 = arith.index_cast %220 : i32 to index
      %c0_133 = arith.constant 0 : index
      %c0_134 = arith.constant 0 : index
      %222 = vector.load %arg5[%221, %c0_133, %c0_134] : memref<4x32x288xbf16, #tpu.memory_space<vmem>>, vector<1x32x288xbf16>
      %223 = vector.shape_cast %222 : vector<1x32x288xbf16> to vector<32x288xbf16>
      %c2_i32_135 = arith.constant 2 : i32
      %224 = arith.muli %c2_i32_135, %arg14 : i32
      %c1_i32_136 = arith.constant 1 : i32
      %225 = arith.addi %224, %c1_i32_136 : i32
      %226 = arith.index_cast %225 : i32 to index
      %c0_137 = arith.constant 0 : index
      %c0_138 = arith.constant 0 : index
      %227 = vector.load %arg6[%226, %c0_137, %c0_138] : memref<4x32x1xf32, #tpu.memory_space<vmem>>, vector<1x32x1xf32>
      %228 = vector.shape_cast %227 : vector<1x32x1xf32> to vector<32x1xf32>
      %cst_139 = arith.constant 0.000000e+00 : f32
      %229 = vector.broadcast %cst_139 : f32 to vector<32x9xf32>
      %230 = vector.extract_strided_slice %218 {offsets = [0, 0], sizes = [32, 39], strides = [1, 1]} : vector<32x48xf32> to vector<32x39xf32>
      %231 = tpu.concatenate %229, %230 in 1 : vector<32x9xf32>, vector<32x39xf32> -> vector<32x48xf32>
      %c0_140 = arith.constant 0 : index
      %c0_141 = arith.constant 0 : index
      %c0_142 = arith.constant 0 : index
      %232 = vector.load %arg2[%c0_140, %c0_141, %c0_142] : memref<9x1x48xf32, #tpu.memory_space<vmem>>, vector<1x1x48xf32>
      %233 = vector.shape_cast %232 : vector<1x1x48xf32> to vector<1x48xf32>
      %234 = vector.broadcast %233 : vector<1x48xf32> to vector<32x48xf32>
      %235 = arith.mulf %231, %234 : vector<32x48xf32>
      %cst_143 = arith.constant 0.000000e+00 : f32
      %236 = vector.broadcast %cst_143 : f32 to vector<32x8xf32>
      %237 = vector.extract_strided_slice %218 {offsets = [0, 0], sizes = [32, 40], strides = [1, 1]} : vector<32x48xf32> to vector<32x40xf32>
      %238 = tpu.concatenate %236, %237 in 1 : vector<32x8xf32>, vector<32x40xf32> -> vector<32x48xf32>
      %c1_144 = arith.constant 1 : index
      %c0_145 = arith.constant 0 : index
      %c0_146 = arith.constant 0 : index
      %239 = vector.load %arg2[%c1_144, %c0_145, %c0_146] : memref<9x1x48xf32, #tpu.memory_space<vmem>>, vector<1x1x48xf32>
      %240 = vector.shape_cast %239 : vector<1x1x48xf32> to vector<1x48xf32>
      %241 = vector.broadcast %240 : vector<1x48xf32> to vector<32x48xf32>
      %242 = arith.mulf %238, %241 : vector<32x48xf32>
      %cst_147 = arith.constant 0.000000e+00 : f32
      %243 = vector.broadcast %cst_147 : f32 to vector<32x7xf32>
      %244 = vector.extract_strided_slice %218 {offsets = [0, 0], sizes = [32, 41], strides = [1, 1]} : vector<32x48xf32> to vector<32x41xf32>
      %245 = tpu.concatenate %243, %244 in 1 : vector<32x7xf32>, vector<32x41xf32> -> vector<32x48xf32>
      %c2_148 = arith.constant 2 : index
      %c0_149 = arith.constant 0 : index
      %c0_150 = arith.constant 0 : index
      %246 = vector.load %arg2[%c2_148, %c0_149, %c0_150] : memref<9x1x48xf32, #tpu.memory_space<vmem>>, vector<1x1x48xf32>
      %247 = vector.shape_cast %246 : vector<1x1x48xf32> to vector<1x48xf32>
      %248 = vector.broadcast %247 : vector<1x48xf32> to vector<32x48xf32>
      %249 = arith.mulf %245, %248 : vector<32x48xf32>
      %cst_151 = arith.constant 0.000000e+00 : f32
      %250 = vector.broadcast %cst_151 : f32 to vector<32x1xf32>
      %251 = vector.extract_strided_slice %218 {offsets = [0, 0], sizes = [32, 47], strides = [1, 1]} : vector<32x48xf32> to vector<32x47xf32>
      %252 = tpu.concatenate %250, %251 in 1 : vector<32x1xf32>, vector<32x47xf32> -> vector<32x48xf32>
      %c3_152 = arith.constant 3 : index
      %c0_153 = arith.constant 0 : index
      %c0_154 = arith.constant 0 : index
      %253 = vector.load %arg2[%c3_152, %c0_153, %c0_154] : memref<9x1x48xf32, #tpu.memory_space<vmem>>, vector<1x1x48xf32>
      %254 = vector.shape_cast %253 : vector<1x1x48xf32> to vector<1x48xf32>
      %255 = vector.broadcast %254 : vector<1x48xf32> to vector<32x48xf32>
      %256 = arith.mulf %252, %255 : vector<32x48xf32>
      %c4_155 = arith.constant 4 : index
      %c0_156 = arith.constant 0 : index
      %c0_157 = arith.constant 0 : index
      %257 = vector.load %arg2[%c4_155, %c0_156, %c0_157] : memref<9x1x48xf32, #tpu.memory_space<vmem>>, vector<1x1x48xf32>
      %258 = vector.shape_cast %257 : vector<1x1x48xf32> to vector<1x48xf32>
      %259 = vector.broadcast %258 : vector<1x48xf32> to vector<32x48xf32>
      %260 = arith.mulf %218, %259 : vector<32x48xf32>
      %cst_158 = arith.constant 0.000000e+00 : f32
      %261 = vector.broadcast %cst_158 : f32 to vector<32x1xf32>
      %262 = vector.extract_strided_slice %218 {offsets = [0, 1], sizes = [32, 47], strides = [1, 1]} : vector<32x48xf32> to vector<32x47xf32>
      %263 = tpu.concatenate %262, %261 in 1 : vector<32x47xf32>, vector<32x1xf32> -> vector<32x48xf32>
      %c5_159 = arith.constant 5 : index
      %c0_160 = arith.constant 0 : index
      %c0_161 = arith.constant 0 : index
      %264 = vector.load %arg2[%c5_159, %c0_160, %c0_161] : memref<9x1x48xf32, #tpu.memory_space<vmem>>, vector<1x1x48xf32>
      %265 = vector.shape_cast %264 : vector<1x1x48xf32> to vector<1x48xf32>
      %266 = vector.broadcast %265 : vector<1x48xf32> to vector<32x48xf32>
      %267 = arith.mulf %263, %266 : vector<32x48xf32>
      %cst_162 = arith.constant 0.000000e+00 : f32
      %268 = vector.broadcast %cst_162 : f32 to vector<32x7xf32>
      %269 = vector.extract_strided_slice %218 {offsets = [0, 7], sizes = [32, 41], strides = [1, 1]} : vector<32x48xf32> to vector<32x41xf32>
      %270 = tpu.concatenate %269, %268 in 1 : vector<32x41xf32>, vector<32x7xf32> -> vector<32x48xf32>
      %c6_163 = arith.constant 6 : index
      %c0_164 = arith.constant 0 : index
      %c0_165 = arith.constant 0 : index
      %271 = vector.load %arg2[%c6_163, %c0_164, %c0_165] : memref<9x1x48xf32, #tpu.memory_space<vmem>>, vector<1x1x48xf32>
      %272 = vector.shape_cast %271 : vector<1x1x48xf32> to vector<1x48xf32>
      %273 = vector.broadcast %272 : vector<1x48xf32> to vector<32x48xf32>
      %274 = arith.mulf %270, %273 : vector<32x48xf32>
      %cst_166 = arith.constant 0.000000e+00 : f32
      %275 = vector.broadcast %cst_166 : f32 to vector<32x8xf32>
      %276 = vector.extract_strided_slice %218 {offsets = [0, 8], sizes = [32, 40], strides = [1, 1]} : vector<32x48xf32> to vector<32x40xf32>
      %277 = tpu.concatenate %276, %275 in 1 : vector<32x40xf32>, vector<32x8xf32> -> vector<32x48xf32>
      %c7_167 = arith.constant 7 : index
      %c0_168 = arith.constant 0 : index
      %c0_169 = arith.constant 0 : index
      %278 = vector.load %arg2[%c7_167, %c0_168, %c0_169] : memref<9x1x48xf32, #tpu.memory_space<vmem>>, vector<1x1x48xf32>
      %279 = vector.shape_cast %278 : vector<1x1x48xf32> to vector<1x48xf32>
      %280 = vector.broadcast %279 : vector<1x48xf32> to vector<32x48xf32>
      %281 = arith.mulf %277, %280 : vector<32x48xf32>
      %cst_170 = arith.constant 0.000000e+00 : f32
      %282 = vector.broadcast %cst_170 : f32 to vector<32x9xf32>
      %283 = vector.extract_strided_slice %218 {offsets = [0, 9], sizes = [32, 39], strides = [1, 1]} : vector<32x48xf32> to vector<32x39xf32>
      %284 = tpu.concatenate %283, %282 in 1 : vector<32x39xf32>, vector<32x9xf32> -> vector<32x48xf32>
      %c8_171 = arith.constant 8 : index
      %c0_172 = arith.constant 0 : index
      %c0_173 = arith.constant 0 : index
      %285 = vector.load %arg2[%c8_171, %c0_172, %c0_173] : memref<9x1x48xf32, #tpu.memory_space<vmem>>, vector<1x1x48xf32>
      %286 = vector.shape_cast %285 : vector<1x1x48xf32> to vector<1x48xf32>
      %287 = vector.broadcast %286 : vector<1x48xf32> to vector<32x48xf32>
      %288 = arith.mulf %284, %287 : vector<32x48xf32>
      %289 = tpu.concatenate %235, %242, %249, %256, %260, %267, %274, %281, %288 in 0 : vector<32x48xf32>, vector<32x48xf32>, vector<32x48xf32>, vector<32x48xf32>, vector<32x48xf32>, vector<32x48xf32>, vector<32x48xf32>, vector<32x48xf32>, vector<32x48xf32> -> vector<288x48xf32>
      %290 = arith.truncf %289 : vector<288x48xf32> to vector<288x48xbf16>
      %cst_174 = arith.constant dense<0.000000e+00> : vector<32x48xf32>
      %291 = tpu.matmul %223, %290, %cst_174 {dimension_numbers = #tpu.dot_dimension_numbers<[1], [0], [0], [1], [0, 0, 1, 1], [], []>} : vector<32x288xbf16>, vector<288x48xbf16>, vector<32x48xf32> -> vector<32x48xf32>
      %292 = vector.broadcast %228 : vector<32x1xf32> to vector<32x48xf32>
      %293 = arith.addf %291, %292 : vector<32x48xf32>
      %294 = arith.addf %293, %arg15 : vector<32x48xf32>
      %cst_175 = arith.constant 0.000000e+00 : f32
      %295 = vector.broadcast %cst_175 : f32 to vector<32x48xf32>
      %296 = arith.cmpf ogt, %294, %295 : vector<32x48xf32>
      %cst_176 = arith.constant 0.00999999977 : f32
      %297 = vector.broadcast %cst_176 : f32 to vector<32x48xf32>
      %298 = arith.mulf %297, %294 : vector<32x48xf32>
      %299 = arith.select %296, %294, %298 : vector<32x48xi1>, vector<32x48xf32>
      scf.yield %299 : vector<32x48xf32>
    }
    %c2_i32_35 = arith.constant 2 : i32
    %c0_36 = arith.constant 0 : index
    %c0_37 = arith.constant 0 : index
    %67 = vector.load %arg7[%c0_36, %c0_37] : memref<8x32xbf16, #tpu.memory_space<vmem>>, vector<8x32xbf16>
    %68 = arith.truncf %66 : vector<32x48xf32> to vector<32x48xbf16>
    %cst_38 = arith.constant dense<0.000000e+00> : vector<8x48xf32>
    %69 = tpu.matmul %67, %68, %cst_38 {dimension_numbers = #tpu.dot_dimension_numbers<[1], [0], [0], [1], [0, 0, 1, 1], [], []>} : vector<8x32xbf16>, vector<32x48xbf16>, vector<8x48xf32> -> vector<8x48xf32>
    %c0_39 = arith.constant 0 : index
    %c0_40 = arith.constant 0 : index
    %70 = vector.load %arg8[%c0_39, %c0_40] : memref<8x1xf32, #tpu.memory_space<vmem>>, vector<8x1xf32>
    %71 = vector.broadcast %70 : vector<8x1xf32> to vector<8x48xf32>
    %72 = arith.addf %69, %71 : vector<8x48xf32>
    %cst_41 = arith.constant 0.000000e+00 : f32
    %73 = vector.broadcast %cst_41 : f32 to vector<8x48xf32>
    %74 = arith.cmpf ogt, %72, %73 : vector<8x48xf32>
    %cst_42 = arith.constant 0.00999999977 : f32
    %75 = vector.broadcast %cst_42 : f32 to vector<8x48xf32>
    %76 = arith.mulf %75, %72 : vector<8x48xf32>
    %77 = arith.select %74, %72, %76 : vector<8x48xi1>, vector<8x48xf32>
    %c0_43 = arith.constant 0 : index
    %c0_44 = arith.constant 0 : index
    %78 = vector.load %arg10[%c0_43, %c0_44] : memref<1x256xf32, #tpu.memory_space<vmem>>, vector<1x256xf32>
    %79 = vector.extract_strided_slice %77 {offsets = [0, 0], sizes = [1, 48], strides = [1, 1]} : vector<8x48xf32> to vector<1x48xf32>
    %80 = arith.truncf %79 : vector<1x48xf32> to vector<1x48xbf16>
    %c0_45 = arith.constant 0 : index
    %c0_46 = arith.constant 0 : index
    %c0_47 = arith.constant 0 : index
    %81 = vector.load %arg9[%c0_45, %c0_46, %c0_47] : memref<8x48x256xbf16, #tpu.memory_space<vmem>>, vector<1x48x256xbf16>
    %82 = vector.shape_cast %81 : vector<1x48x256xbf16> to vector<48x256xbf16>
    %cst_48 = arith.constant dense<0.000000e+00> : vector<1x256xf32>
    %83 = tpu.matmul %80, %82, %cst_48 {dimension_numbers = #tpu.dot_dimension_numbers<[1], [0], [0], [1], [0, 0, 1, 1], [], []>} : vector<1x48xbf16>, vector<48x256xbf16>, vector<1x256xf32> -> vector<1x256xf32>
    %84 = arith.addf %78, %83 : vector<1x256xf32>
    %85 = vector.extract_strided_slice %77 {offsets = [1, 0], sizes = [1, 48], strides = [1, 1]} : vector<8x48xf32> to vector<1x48xf32>
    %86 = arith.truncf %85 : vector<1x48xf32> to vector<1x48xbf16>
    %c1_49 = arith.constant 1 : index
    %c0_50 = arith.constant 0 : index
    %c0_51 = arith.constant 0 : index
    %87 = vector.load %arg9[%c1_49, %c0_50, %c0_51] : memref<8x48x256xbf16, #tpu.memory_space<vmem>>, vector<1x48x256xbf16>
    %88 = vector.shape_cast %87 : vector<1x48x256xbf16> to vector<48x256xbf16>
    %cst_52 = arith.constant dense<0.000000e+00> : vector<1x256xf32>
    %89 = tpu.matmul %86, %88, %cst_52 {dimension_numbers = #tpu.dot_dimension_numbers<[1], [0], [0], [1], [0, 0, 1, 1], [], []>} : vector<1x48xbf16>, vector<48x256xbf16>, vector<1x256xf32> -> vector<1x256xf32>
    %90 = arith.addf %84, %89 : vector<1x256xf32>
    %91 = vector.extract_strided_slice %77 {offsets = [2, 0], sizes = [1, 48], strides = [1, 1]} : vector<8x48xf32> to vector<1x48xf32>
    %92 = arith.truncf %91 : vector<1x48xf32> to vector<1x48xbf16>
    %c2_53 = arith.constant 2 : index
    %c0_54 = arith.constant 0 : index
    %c0_55 = arith.constant 0 : index
    %93 = vector.load %arg9[%c2_53, %c0_54, %c0_55] : memref<8x48x256xbf16, #tpu.memory_space<vmem>>, vector<1x48x256xbf16>
    %94 = vector.shape_cast %93 : vector<1x48x256xbf16> to vector<48x256xbf16>
    %cst_56 = arith.constant dense<0.000000e+00> : vector<1x256xf32>
    %95 = tpu.matmul %92, %94, %cst_56 {dimension_numbers = #tpu.dot_dimension_numbers<[1], [0], [0], [1], [0, 0, 1, 1], [], []>} : vector<1x48xbf16>, vector<48x256xbf16>, vector<1x256xf32> -> vector<1x256xf32>
    %96 = arith.addf %90, %95 : vector<1x256xf32>
    %97 = vector.extract_strided_slice %77 {offsets = [3, 0], sizes = [1, 48], strides = [1, 1]} : vector<8x48xf32> to vector<1x48xf32>
    %98 = arith.truncf %97 : vector<1x48xf32> to vector<1x48xbf16>
    %c3_57 = arith.constant 3 : index
    %c0_58 = arith.constant 0 : index
    %c0_59 = arith.constant 0 : index
    %99 = vector.load %arg9[%c3_57, %c0_58, %c0_59] : memref<8x48x256xbf16, #tpu.memory_space<vmem>>, vector<1x48x256xbf16>
    %100 = vector.shape_cast %99 : vector<1x48x256xbf16> to vector<48x256xbf16>
    %cst_60 = arith.constant dense<0.000000e+00> : vector<1x256xf32>
    %101 = tpu.matmul %98, %100, %cst_60 {dimension_numbers = #tpu.dot_dimension_numbers<[1], [0], [0], [1], [0, 0, 1, 1], [], []>} : vector<1x48xbf16>, vector<48x256xbf16>, vector<1x256xf32> -> vector<1x256xf32>
    %102 = arith.addf %96, %101 : vector<1x256xf32>
    %103 = vector.extract_strided_slice %77 {offsets = [4, 0], sizes = [1, 48], strides = [1, 1]} : vector<8x48xf32> to vector<1x48xf32>
    %104 = arith.truncf %103 : vector<1x48xf32> to vector<1x48xbf16>
    %c4_61 = arith.constant 4 : index
    %c0_62 = arith.constant 0 : index
    %c0_63 = arith.constant 0 : index
    %105 = vector.load %arg9[%c4_61, %c0_62, %c0_63] : memref<8x48x256xbf16, #tpu.memory_space<vmem>>, vector<1x48x256xbf16>
    %106 = vector.shape_cast %105 : vector<1x48x256xbf16> to vector<48x256xbf16>
    %cst_64 = arith.constant dense<0.000000e+00> : vector<1x256xf32>
    %107 = tpu.matmul %104, %106, %cst_64 {dimension_numbers = #tpu.dot_dimension_numbers<[1], [0], [0], [1], [0, 0, 1, 1], [], []>} : vector<1x48xbf16>, vector<48x256xbf16>, vector<1x256xf32> -> vector<1x256xf32>
    %108 = arith.addf %102, %107 : vector<1x256xf32>
    %109 = vector.extract_strided_slice %77 {offsets = [5, 0], sizes = [1, 48], strides = [1, 1]} : vector<8x48xf32> to vector<1x48xf32>
    %110 = arith.truncf %109 : vector<1x48xf32> to vector<1x48xbf16>
    %c5_65 = arith.constant 5 : index
    %c0_66 = arith.constant 0 : index
    %c0_67 = arith.constant 0 : index
    %111 = vector.load %arg9[%c5_65, %c0_66, %c0_67] : memref<8x48x256xbf16, #tpu.memory_space<vmem>>, vector<1x48x256xbf16>
    %112 = vector.shape_cast %111 : vector<1x48x256xbf16> to vector<48x256xbf16>
    %cst_68 = arith.constant dense<0.000000e+00> : vector<1x256xf32>
    %113 = tpu.matmul %110, %112, %cst_68 {dimension_numbers = #tpu.dot_dimension_numbers<[1], [0], [0], [1], [0, 0, 1, 1], [], []>} : vector<1x48xbf16>, vector<48x256xbf16>, vector<1x256xf32> -> vector<1x256xf32>
    %114 = arith.addf %108, %113 : vector<1x256xf32>
    %115 = vector.extract_strided_slice %77 {offsets = [6, 0], sizes = [1, 48], strides = [1, 1]} : vector<8x48xf32> to vector<1x48xf32>
    %116 = arith.truncf %115 : vector<1x48xf32> to vector<1x48xbf16>
    %c6_69 = arith.constant 6 : index
    %c0_70 = arith.constant 0 : index
    %c0_71 = arith.constant 0 : index
    %117 = vector.load %arg9[%c6_69, %c0_70, %c0_71] : memref<8x48x256xbf16, #tpu.memory_space<vmem>>, vector<1x48x256xbf16>
    %118 = vector.shape_cast %117 : vector<1x48x256xbf16> to vector<48x256xbf16>
    %cst_72 = arith.constant dense<0.000000e+00> : vector<1x256xf32>
    %119 = tpu.matmul %116, %118, %cst_72 {dimension_numbers = #tpu.dot_dimension_numbers<[1], [0], [0], [1], [0, 0, 1, 1], [], []>} : vector<1x48xbf16>, vector<48x256xbf16>, vector<1x256xf32> -> vector<1x256xf32>
    %120 = arith.addf %114, %119 : vector<1x256xf32>
    %121 = vector.extract_strided_slice %77 {offsets = [7, 0], sizes = [1, 48], strides = [1, 1]} : vector<8x48xf32> to vector<1x48xf32>
    %122 = arith.truncf %121 : vector<1x48xf32> to vector<1x48xbf16>
    %c7_73 = arith.constant 7 : index
    %c0_74 = arith.constant 0 : index
    %c0_75 = arith.constant 0 : index
    %123 = vector.load %arg9[%c7_73, %c0_74, %c0_75] : memref<8x48x256xbf16, #tpu.memory_space<vmem>>, vector<1x48x256xbf16>
    %124 = vector.shape_cast %123 : vector<1x48x256xbf16> to vector<48x256xbf16>
    %cst_76 = arith.constant dense<0.000000e+00> : vector<1x256xf32>
    %125 = tpu.matmul %122, %124, %cst_76 {dimension_numbers = #tpu.dot_dimension_numbers<[1], [0], [0], [1], [0, 0, 1, 1], [], []>} : vector<1x48xbf16>, vector<48x256xbf16>, vector<1x256xf32> -> vector<1x256xf32>
    %126 = arith.addf %120, %125 : vector<1x256xf32>
    %cst_77 = arith.constant 0.000000e+00 : f32
    %127 = vector.broadcast %cst_77 : f32 to vector<1x256xf32>
    %128 = arith.cmpf ogt, %126, %127 : vector<1x256xf32>
    %cst_78 = arith.constant 0.00999999977 : f32
    %129 = vector.broadcast %cst_78 : f32 to vector<1x256xf32>
    %130 = arith.mulf %129, %126 : vector<1x256xf32>
    %131 = arith.select %128, %126, %130 : vector<1x256xi1>, vector<1x256xf32>
    %c0_79 = arith.constant 0 : index
    %c0_80 = arith.constant 0 : index
    %132 = vector.load %arg11[%c0_79, %c0_80] : memref<1x256xf32, #tpu.memory_space<vmem>>, vector<1x256xf32>
    %133 = arith.mulf %131, %132 : vector<1x256xf32>
    %cst_81 = arith.constant dense<0.000000e+00> : vector<1xf32>
    %134 = vector.multi_reduction <add>, %133, %cst_81 [1] : vector<1x256xf32> to vector<1xf32>
    %135 = vector.shape_cast %134 : vector<1xf32> to vector<1x1xf32>
    %c0_82 = arith.constant 0 : index
    %c0_83 = arith.constant 0 : index
    %136 = vector.load %arg12[%c0_82, %c0_83] : memref<1x1xf32, #tpu.memory_space<vmem>>, vector<1x1xf32>
    %137 = arith.addf %135, %136 : vector<1x1xf32>
    %c0_84 = arith.constant 0 : index
    %c0_85 = arith.constant 0 : index
    %c0_86 = arith.constant 0 : index
    %138 = vector.load %arg13[%c0_84, %c0_85, %c0_86] : memref<1x1x1xf32, #tpu.memory_space<vmem>>, vector<1x1x1xf32>
    %139 = vector.shape_cast %138 : vector<1x1x1xf32> to vector<1x1xf32>
    %140 = vector.shape_cast %137 : vector<1x1xf32> to vector<1x1x1xf32>
    tpu.vector_store %arg13[%c0_84, %c0_85, %c0_86], %140 {strides = array<i32>} : memref<1x1x1xf32, #tpu.memory_space<vmem>>, vector<1x1x1xf32>,
    return
  }
  func.func @transform_0(%arg0: i32) -> (i32, i32, i32) {
    %c0_i32 = arith.constant 0 : i32
    %c0_i32_0 = arith.constant 0 : i32
    %c0_i32_1 = arith.constant 0 : i32
    return %arg0, %c0_i32, %c0_i32_0 : i32, i32, i32
  }
  func.func @transform_1(%arg0: i32) -> (i32, i32, i32) {
    %c0_i32 = arith.constant 0 : i32
    %c0_i32_0 = arith.constant 0 : i32
    %c0_i32_1 = arith.constant 0 : i32
    %c0_i32_2 = arith.constant 0 : i32
    return %c0_i32, %c0_i32_0, %c0_i32_1 : i32, i32, i32
  }
  func.func @transform_2(%arg0: i32) -> (i32, i32) {
    %c0_i32 = arith.constant 0 : i32
    %c0_i32_0 = arith.constant 0 : i32
    %c0_i32_1 = arith.constant 0 : i32
    return %c0_i32, %c0_i32_0 : i32, i32
  }
  func.func @transform_3(%arg0: i32) -> (i32, i32) {
    %c0_i32 = arith.constant 0 : i32
    %c0_i32_0 = arith.constant 0 : i32
    %c0_i32_1 = arith.constant 0 : i32
    return %c0_i32, %c0_i32_0 : i32, i32
  }
  func.func @transform_4(%arg0: i32) -> (i32, i32, i32) {
    %c0_i32 = arith.constant 0 : i32
    %c0_i32_0 = arith.constant 0 : i32
    %c0_i32_1 = arith.constant 0 : i32
    %c0_i32_2 = arith.constant 0 : i32
    return %c0_i32, %c0_i32_0, %c0_i32_1 : i32, i32, i32
  }
  func.func @transform_5(%arg0: i32) -> (i32, i32, i32) {
    %c0_i32 = arith.constant 0 : i32
    %c0_i32_0 = arith.constant 0 : i32
    %c0_i32_1 = arith.constant 0 : i32
    %c0_i32_2 = arith.constant 0 : i32
    return %c0_i32, %c0_i32_0, %c0_i32_1 : i32, i32, i32
  }
  func.func @transform_6(%arg0: i32) -> (i32, i32) {
    %c0_i32 = arith.constant 0 : i32
    %c0_i32_0 = arith.constant 0 : i32
    %c0_i32_1 = arith.constant 0 : i32
    return %c0_i32, %c0_i32_0 : i32, i32
  }
  func.func @transform_7(%arg0: i32) -> (i32, i32) {
    %c0_i32 = arith.constant 0 : i32
    %c0_i32_0 = arith.constant 0 : i32
    %c0_i32_1 = arith.constant 0 : i32
    return %c0_i32, %c0_i32_0 : i32, i32
  }
  func.func @transform_8(%arg0: i32) -> (i32, i32, i32) {
    %c0_i32 = arith.constant 0 : i32
    %c0_i32_0 = arith.constant 0 : i32
    %c0_i32_1 = arith.constant 0 : i32
    %c0_i32_2 = arith.constant 0 : i32
    return %c0_i32, %c0_i32_0, %c0_i32_1 : i32, i32, i32
  }
  func.func @transform_9(%arg0: i32) -> (i32, i32) {
    %c0_i32 = arith.constant 0 : i32
    %c0_i32_0 = arith.constant 0 : i32
    %c0_i32_1 = arith.constant 0 : i32
    return %c0_i32, %c0_i32_0 : i32, i32
  }
  func.func @transform_10(%arg0: i32) -> (i32, i32) {
    %c0_i32 = arith.constant 0 : i32
    %c0_i32_0 = arith.constant 0 : i32
    %c0_i32_1 = arith.constant 0 : i32
    return %c0_i32, %c0_i32_0 : i32, i32
  }
  func.func @transform_11(%arg0: i32) -> (i32, i32) {
    %c0_i32 = arith.constant 0 : i32
    %c0_i32_0 = arith.constant 0 : i32
    %c0_i32_1 = arith.constant 0 : i32
    return %c0_i32, %c0_i32_0 : i32, i32
  }
  func.func @transform_12(%arg0: i32) -> (i32, i32, i32) {
    %c0_i32 = arith.constant 0 : i32
    %c0_i32_0 = arith.constant 0 : i32
    %c0_i32_1 = arith.constant 0 : i32
    return %arg0, %c0_i32, %c0_i32_0 : i32, i32, i32
  }
}

</mosaic_0001>

<bundles_post_ra>
// kernel: azdqn_forward.1
= control target key start
LH: loop header
LB: loop body
LE: loop exit
PB: predicated region body
PF: predicated region fallthrough
CT: control target
= control target key end

     0   :  { %s3336_s0 = inlined_call_operand.vmem [shape: f32[2,1,48], index: 0, kind: input, shape index: {}]   ;;  %s3337_s1 = inlined_call_operand.vmem [shape: f32[9,1,48], index: 1, kind: input, shape index: {}]   ;;  %s3338_s2 = inlined_call_operand.vmem [shape: bf16[32,9], index: 2, kind: input, shape index: {}]   ;;  %s3339_s3 = inlined_call_operand.vmem [shape: f32[32,1], index: 3, kind: input, shape index: {}]   ;;  %s3340_s4 = inlined_call_operand.hbm [shape: bf16[4,32,288], index: 4, kind: input, shape index: {}]   ;;  %s3341_s5 = inlined_call_operand.vmem [shape: f32[4,32,1], index: 5, kind: input, shape index: {}]   ;;  %s3342_s6 = inlined_call_operand.vmem [shape: bf16[8,32], index: 6, kind: input, shape index: {}]   ;;  %s3343_s7 = inlined_call_operand.vmem [shape: f32[8,1], index: 7, kind: input, shape index: {}]   ;;  %s3344_s8 = inlined_call_operand.hbm [shape: bf16[8,48,256], index: 8, kind: input, shape index: {}]   ;;  %s3345_s9 = inlined_call_operand.vmem [shape: f32[1,256], index: 9, kind: input, shape index: {}]   ;;  %s3346_s10 = inlined_call_operand.vmem [shape: f32[1,256], index: 10, kind: input, shape index: {}]   ;;  %s3347_s11 = inlined_call_operand.<no memory space> [shape: f32[1,1], index: 11, kind: input, shape index: {}]   ;;  %s3348_s12 = inlined_call_operand.vmem [shape: f32[2,1,1], index: 12, kind: output, shape index: {}]  }
   0x1   :  { %v17_v0 = vstv %s3347_s11 }
   0x2   :  { %18 = vst [vmem:[#allocation2] sm:$0x1] %v17_v0 }
   0x3   :  { %19 = vsyncpa [#allocation4], 0 }
   0x4   :  { %20 = vsyncpa [#allocation6], 0  ;;  %s2769_s23 = smov 0  }
   0x5 LB: > { %s334_s26 = sshll.u32 %s3340_s4, 4  ;;  %s2065_s27 = sadd.s32 4294967295, %s2654_s23   ;;  %s2654_s23 = sphi %s2769_s23, %s26_s23   ;;  %s335_s26 = int_to_ptr.hbm [resolvable:$true] %s334_s26 }
   0x6   : > { %p2067_p0 = scmp.ge.s32.totalorder %s2654_s23, 1  ;;  %p314_p1 = scmp.lt.s32.totalorder %s2654_s23, 3 }
   0x7   : > { %p2466_p2 = scmp.eq.s32.totalorder %s2065_s27, 0  ;;  %s2676_s28 = smov [#allocation3]  }
   0x8   : > { %p2780_p3 = pnand %p2067_p0, %p314_p1  ;;  %s336_s29 = sshll.u32 %s2676_s28, 4  ;;  %s337_s29 = int_to_ptr.vmem [resolvable:$true] %s336_s29 }
   0x9   : > { %s357_s14 = sshll.u32 %s3344_s8, 4  ;;  %s2677_s15 = smov [#allocation5]   ;;  %s358_s14 = int_to_ptr.hbm [resolvable:$true] %s357_s14 }
   0xa   : > { %p2459_p4 = pneg %p2780_p3  ;;  %s359_s16 = sshll.u32 %s2677_s15, 4  ;;  %s360_s16 = int_to_ptr.vmem [resolvable:$true] %s359_s16 }
   0xb   : > { %s2678_s17 = smov 192   ;;  %s2679_s18 = smov 12  }
   0xc   : > { %p2460_p5 = pnand %p2466_p2, %p2459_p4  ;;  %s2680_s19 = smov 128  }
   0xd   : > { %s2681_s20 = smov 8   ;;  %390 = sbr.rel (%p2780_p3) target bundleno = 1468 (0x5bc), region = 68 }
   0xe   : > { %2462 = dma.hbm_to_vmem [thread:$0]  (!%p2460_p5), %s335_s26, 3072, %s337_s29, [#allocation4], %s2678_s17, %s2678_s17, %s2679_s18  }
   0xf   : > { %2465 = dma.hbm_to_vmem [thread:$0]  (!%p2460_p5), %s358_s14, 6144, %s360_s16, [#allocation6], %s2680_s19, %s2680_s19, %s2681_s20  }
  0x12   : > { %2645 = dma.done.wait (%p2466_p2), [#allocation4], 3072  }
  0x13   : > { %2647 = vsyncadd (%p2466_p2), [#allocation4], 4294964224 }
  0x14   : > { %2649 = dma.done.wait (%p2466_p2), [#allocation6], 6144  }
  0x15   : > { %2651 = vsyncadd (%p2466_p2), [#allocation6], 4294961152  ;;  %p434_p6 = scmp.lt.s32.totalorder %s2065_s27, 1  ;;  %s2682_s28 = smov 8   ;;  %v448_v3 = vld [vmem:[%s3339_s3 + $0x10] sm:$0xff]  ;;  %v447_v4 = vld [vmem:[%s3339_s3 + $0x8] sm:$0xff] }
  0x16   : > { %s2683_s29 = smov 9   ;;  %s2684_s30 = smov 127   ;;  %vm462_vm0 = vcmask 64512   ;;  %v2690_v5 = vmov 0   ;;  %v446_v6 = vld [vmem:[%s3339_s3] sm:$0xff]  ;;  %vm455_vm1 = vcmask 72704  }
  0x17   : > { %s3355_s27 = smov (!%p434_p6, %s2065_s27), 1  ;;  %s2685_s13 = smov 7   ;;  %2545 = vset.pattern.permute.xlu1 %v2690_v5  ;;  %2544 = vset.pattern.permute.xlu0 %v2690_v5  ;;  %v2074_v9 = vld [vmem:[%s3337_s1 + $0x1] sm:$0x1]  ;;  %vm489_vm2 = vcmask 384000   ;;  %vm470_vm3 = vcmask 56320  }
  0x18   : > { %s2802_s24 = scalar_lea.vmem %s3336_s0, %s3355_s27  ;;  %s439_s11 = scalar_lea.vmem %s3348_s12, %s3355_s27  ;;  %2543 = vset.pattern.permute.xlu2 %v2690_v5  ;;  %v2077_v13 = vld [vmem:[%s3337_s1 + $0x4] sm:$0x1]  ;;  %v457_v14 = vld [vmem:[%s3337_s1] sm:$0x1]  ;;  %vm478_vm4 = vcmask 7168   ;;  %vm497_vm5 = vcmask 334848  }
  0x19   : > { %v2546_v1 = vld [vmem:[%s2802_s24] ss:$0 sm:$0xff]  ;;  %s2686_s14 = smov 1   ;;  %s2687_s15 = smov 121   ;;  %v2075_v16 = vld [vmem:[%s3337_s1 + $0x2] sm:$0x1] }
  0x1a   : > { %459 = vrot.lane.b32.xlu0 %v2546_v1, %s2682_s28  ;;  %452 = vrot.lane.b32.xlu1 %v2546_v1, %s2683_s29  ;;  %s2688_s16 = smov 120   ;;  %s2689_s17 = smov 119   ;;  %v441_v11 = vld [vmem:[%s2802_s24] sm:$0x1]  ;;  %v2076_v17 = vld [vmem:[%s3337_s1 + $0x3] sm:$0x1] }
  0x1b   : > { %486 = vrot.lane.b32.xlu2 %v2546_v1, %s2684_s30  ;;  %v449_v19 = vld [vmem:[%s3339_s3 + $0x18] sm:$0xff]  ;;  %v2078_v20 = vld [vmem:[%s3337_s1 + $0x5] sm:$0x1]  ;;  %v485_v24 = vmul.f32 %v2077_v13, %v441_v11  ;;  %vm539_vm6 = vcmask 1040384   ;;  %v2079_v31 = vld [vmem:[%s3337_s1 + $0x6] sm:$0x1] }
  0x1c   : > { %vm541_vm7 = vcmask 1041408   ;;  %vm543_vm8 = vcmask 1042432   ;;  %vm545_vm9 = vcmask 1043456   ;;  %vm505_vm10 = vcmask 326656   ;;  %v2080_v41 = vld [vmem:[%s3337_s1 + $0x7] sm:$0x1] }
  0x1d   : > { %v528_v36 = vperm.slane %v485_v24, 0  ;;  %vm513_vm11 = vcmask 318464   ;;  %vm547_vm12 = vcmask 1044480   ;;  %v2081_v44 = vld [vmem:[%s3337_s1 + $0x8] sm:$0x1]  ;;  %vm549_vm13 = vcmask 1045504  }
  0x1e   : > { %vm551_vm14 = vcmask 1046528   ;;  %v2691_v53 = vmov 65535   ;;  %v2383_v61 = vld [vmem:[%s3338_s2] sm:$0xff]  ;;  %v2384_v62 = vld [vmem:[%s3338_s2 + $0x8] sm:$0xff] }
  0x1f   : > { %v590_v54 = vsel %vm545_vm9, 4294967295, %v2691_v53 }
  0x20   : > { %v591_v58 = vsel %vm547_vm12, %v590_v54, 0 }
  0x22   : > { %467 = vrot.lane.b32.xlu0 %v2546_v1, %s2685_s13  ;;  %475 = vrot.lane.b32.xlu1 %v2546_v1, %s2686_s14 }
  0x23   : > { %494 = vrot.lane.b32.xlu2 %v2546_v1, %s2687_s15 }
  0x2a   : > { %502 = vrot.lane.b32.xlu0 %v2546_v1, %s2688_s16  ;;  %510 = vrot.lane.b32.xlu1 %v2546_v1, %s2689_s17  ;;  %s2881_s17 = smov 0  }
  0x2b   : > { %556 = vperm.xlu2 %2543, %v446_v6  }
  0x32   : > { %566 = vperm.xlu1 %2545, %v448_v3   ;;  %561 = vperm.xlu0 %2544, %v447_v4  }
  0x33   : > { %571 = vperm.xlu2 %2543, %v449_v19  }
  0x75   : > { %v487_v2 = vpop.permute.xlu2 %486 }
  0x76   : > { %v490_v21 = vsel %vm489_vm2, %v487_v2, 0.0 }
  0x77   : > { %v493_v33 = vmul.f32 %v2078_v20, %v490_v21 }
  0x79   : > { %v531_v42 = vrot.slane %v493_v33, 3 }
  0x7d   : > { %v495_v18 = vpop.permute.xlu2 %494 }
  0x7e   : > { %v498_v32 = vsel %vm497_vm5, %v495_v18, 0.0 }
  0x7f   : > { %v501_v38 = vmul.f32 %v2079_v31, %v498_v32 }
  0x81   : > { %v534_v47 = vrot.slane %v501_v38, 2 }
  0x85   : > { %v557_v63 = vpop.permute.xlu2 %556 }
  0x8c   : > { %v460_v7 = vpop.permute.xlu0 %459  ;;  %v453_v8 = vpop.permute.xlu1 %452 }
  0x8d   : > { %v463_v10 = vsel %vm462_vm0, 0.0, %v460_v7  ;;  %v456_v15 = vsel %vm455_vm1, 0.0, %v453_v8  ;;  %v572_v11 = vpop.permute.xlu2 %571 }
  0x8e   : > { %v466_v12 = vmul.f32 %v2074_v9, %v463_v10  ;;  %v458_v26 = vmul.f32 %v457_v14, %v456_v15 }
  0x90   : > { %v519_v25 = vrot.slane %v466_v12, 7 }
  0x92   : > { %v540_v37 = vsel %vm539_vm6, %v458_v26, %v519_v25 }
  0x94   : > { %v468_v22 = vpop.permute.xlu0 %467  ;;  %v476_v23 = vpop.permute.xlu1 %475 }
  0x95   : > { %v471_v27 = vsel %vm470_vm3, 0.0, %v468_v22  ;;  %v479_v28 = vsel %vm478_vm4, 0.0, %v476_v23 }
  0x96   : > { %v474_v29 = vmul.f32 %v2075_v16, %v471_v27  ;;  %v482_v30 = vmul.f32 %v2076_v17, %v479_v28 }
  0x98   : > { %v522_v34 = vrot.slane %v474_v29, 6  ;;  %v525_v35 = vrot.slane %v482_v30, 5 }
  0x9a   : > { %v542_v39 = vsel %vm541_vm7, %v540_v37, %v522_v34 }
  0x9b   : > { %v544_v40 = vsel %vm543_vm8, %v542_v39, %v525_v35 }
  0x9c   : > { %v503_v43 = vpop.permute.xlu0 %502  ;;  %v511_v45 = vpop.permute.xlu1 %510  ;;  %v546_v46 = vsel %vm545_vm9, %v544_v40, %v528_v36 }
  0x9d   : > { %v506_v48 = vsel %vm505_vm10, %v503_v43, 0.0  ;;  %v514_v49 = vsel %vm513_vm11, %v511_v45, 0.0  ;;  %v548_v51 = vsel %vm547_vm12, %v546_v46, %v531_v42 }
  0x9e   : > { %v509_v50 = vmul.f32 %v2080_v41, %v506_v48  ;;  %v517_v52 = vmul.f32 %v2081_v44, %v514_v49  ;;  %v550_v56 = vsel %vm549_vm13, %v548_v51, %v534_v47 }
  0xa0   : > { %v537_v55 = vrot.slane %v509_v50, 1 }
  0xa2   : > { %v552_v57 = vsel %vm551_vm14, %v550_v56, %v537_v55 }
  0xa3   : > { %v553_v59 = vpack.c.bf16 %v517_v52, %v552_v57 }
  0xa4   : > { %v567_v0 = vpop.permute.xlu1 %566  ;;  %v562_v10 = vpop.permute.xlu0 %561 }
  0xa5   : > { %v593_v60 = vand.u32 %v591_v58, %v553_v59 }
  0xa7   : > { %602 = vmatpush.bf16.msra.mxu0 %v593_v60  ;;  %2448 = vmatpush.bf16.msra.mxu1 %v593_v60 }
  0xaa   : > { %2090 = vmatmul.msk.bf16.vlgmr.msra.gmra.mxu0 %vm455_vm1, %v2383_v61  ;;  %2091 = vmatmul.msk.bf16.vlgmr.msra.gmra.mxu1 %vm455_vm1, %v2384_v62 }
 0x127   : > { %v604_v1 = vpop.f32.mrf.mxu0  ;;  %v609_v2 = vpop.f32.mrf.mxu1 }
 0x128   : > { %v605_v3 = vadd.f32 %v604_v1, %v557_v63  ;;  %v610_v4 = vadd.f32 %v609_v2, %v567_v0 }
 0x12a   : > { %vm614_vm15 = vcmp.gt.f32.partialorder %v605_v3, 0.0  ;;  %v618_v6 = vmul.f32 0.01, %v605_v3  ;;  %vm616_vm7 = vcmp.gt.f32.partialorder %v610_v4, 0.0  ;;  %v620_v7 = vmul.f32 0.01, %v610_v4 }
 0x12c   : > { %v622_v8 = vsel %vm614_vm15, %v605_v3, %v618_v6   ;;  %v624_v9 = vsel %vm616_vm7, %v610_v4, %v620_v7  }
 0x12f   : > { %v606_v12 = vpop.f32.mrf.mxu0  ;;  %v611_v13 = vpop.f32.mrf.mxu1 }
 0x130   : > { %v612_v14 = vadd.f32 %v611_v13, %v572_v11  ;;  %v607_v15 = vadd.f32 %v606_v12, %v562_v10 }
 0x132   : > { %vm617_vm8 = vcmp.gt.f32.partialorder %v612_v14, 0.0  ;;  %v621_v16 = vmul.f32 0.01, %v612_v14  ;;  %vm615_vm9 = vcmp.gt.f32.partialorder %v607_v15, 0.0  ;;  %v619_v17 = vmul.f32 0.01, %v607_v15 }
 0x134   : > { %v625_v18 = vsel %vm617_vm8, %v612_v14, %v621_v16   ;;  %v623_v19 = vsel %vm615_vm9, %v607_v15, %v619_v17  }
 0x135 LB: >> { %s2692_s24 = smov 120   ;;  %s2693_s18 = smov 1   ;;  %v2965_v26 = vld [vmem:[%s3337_s1 + $0x3] ss:$0 sm:$0xff]  ;;  %v2970_v27 = vld [vmem:[%s3337_s1 + $0x7] ss:$0 sm:$0xff]  ;;  %s2674_s17 = sphi %s2881_s17, %s631_s17   ;;  %v2670_v8 = vphi %v622_v8, %v3353_v8   ;;  %v2666_v19 = vphi %v623_v19, %v3352_v19   ;;  %v2662_v9 = vphi %v624_v9, %v3351_v9   ;;  %v2658_v18 = vphi %v625_v18, %v3350_v18  }
 0x136   : >> { %814 = vrot.lane.b32.xlu1 %v2662_v9, %s2692_s24  ;;  %734 = vrot.lane.b32.xlu0 %v2662_v9, %s2693_s18  ;;  %s2694_s19 = smov 7   ;;  %s2695_s20 = smov 121   ;;  %v2991_v53 = vld [vmem:[%s3337_s1 + $0x6] ss:$0 sm:$0xff]  ;;  %v2997_v55 = vld [vmem:[%s3337_s1 + $0x2] ss:$0 sm:$0xff] }
 0x137   : >> { %730 = vrot.lane.b32.xlu2 %v2670_v8, %s2693_s18  ;;  %s2696_s21 = smov 8   ;;  %s2697_s22 = smov 127   ;;  %v3013_v15 = vld [vmem:[%s3337_s1 + $0x1] ss:$0 sm:$0xff]  ;;  %vm926_vm12 = vcmask 261120  }
 0x138   : >> { %s2698_s25 = smov 119   ;;  %s2699_s26 = smov 9  }
 0x139   : >> { %s2392_s15 = sshll.u32 %s2674_s17, 6  ;;  %s2385_s14 = smul.u32 96, %s2674_s17 }
 0x13a   : >> { %s3043_s13 = scalar_lea.vmem %s3341_s5, %s2392_s15  ;;  %s631_s17 = sadd.s32 1, %s2674_s17  }
 0x13b   : >> { %s3070_s28 = scalar_lea.vmem [#allocation3], %s2385_s14  ;;  %p628_p7 = scmp.ge.s32.totalorder %s631_s17, 2  }
 0x13e   : >> { %816 = vrot.lane.b32.xlu1 %v2658_v18, %s2692_s24  ;;  %736 = vrot.lane.b32.xlu0 %v2658_v18, %s2693_s18 }
 0x13f   : >> { %732 = vrot.lane.b32.xlu2 %v2666_v19, %s2693_s18 }
 0x146   : >> { %812 = vrot.lane.b32.xlu1 %v2666_v19, %s2692_s24  ;;  %810 = vrot.lane.b32.xlu0 %v2670_v8, %s2692_s24 }
 0x147   : >> { %710 = vrot.lane.b32.xlu2 %v2662_v9, %s2694_s19 }
 0x14e   : >> { %790 = vrot.lane.b32.xlu1 %v2662_v9, %s2695_s20  ;;  %712 = vrot.lane.b32.xlu0 %v2658_v18, %s2694_s19 }
 0x14f   : >> { %792 = vrot.lane.b32.xlu2 %v2658_v18, %s2695_s20 }
 0x156   : >> { %708 = vrot.lane.b32.xlu1 %v2666_v19, %s2694_s19  ;;  %706 = vrot.lane.b32.xlu0 %v2670_v8, %s2694_s19 }
 0x157   : >> { %786 = vrot.lane.b32.xlu2 %v2670_v8, %s2695_s20 }
 0x15e   : >> { %686 = vrot.lane.b32.xlu1 %v2662_v9, %s2696_s21  ;;  %788 = vrot.lane.b32.xlu0 %v2666_v19, %s2695_s20 }
 0x15f   : >> { %688 = vrot.lane.b32.xlu2 %v2658_v18, %s2696_s21 }
 0x166   : >> { %768 = vrot.lane.b32.xlu1 %v2658_v18, %s2697_s22  ;;  %766 = vrot.lane.b32.xlu0 %v2662_v9, %s2697_s22 }
 0x167   : >> { %682 = vrot.lane.b32.xlu2 %v2670_v8, %s2696_s21 }
 0x16e   : >> { %762 = vrot.lane.b32.xlu1 %v2670_v8, %s2697_s22  ;;  %684 = vrot.lane.b32.xlu0 %v2666_v19, %s2696_s21 }
 0x16f   : >> { %764 = vrot.lane.b32.xlu2 %v2666_v19, %s2697_s22 }
 0x176   : >> { %840 = vrot.lane.b32.xlu1 %v2658_v18, %s2698_s25  ;;  %838 = vrot.lane.b32.xlu0 %v2662_v9, %s2698_s25 }
 0x177   : >> { %662 = vrot.lane.b32.xlu2 %v2662_v9, %s2699_s26 }
 0x17e   : >> { %834 = vrot.lane.b32.xlu1 %v2670_v8, %s2698_s25  ;;  %664 = vrot.lane.b32.xlu0 %v2658_v18, %s2699_s26 }
 0x17f   : >> { %836 = vrot.lane.b32.xlu2 %v2666_v19, %s2698_s25 }
 0x186   : >> { %660 = vrot.lane.b32.xlu1 %v2666_v19, %s2699_s26  ;;  %658 = vrot.lane.b32.xlu0 %v2670_v8, %s2699_s26 }
 0x191   : >> { %v731_v20 = vpop.permute.xlu2 %730 }
 0x192   : >> { %v742_v32 = vsel %vm478_vm4, 0.0, %v731_v20 }
 0x193   : >> { %v750_v40 = vmul.f32 %v2965_v26, %v742_v32 }
 0x199   : >> { %v733_v21 = vpop.permute.xlu2 %732 }
 0x19a   : >> { %v743_v33 = vsel %vm478_vm4, 0.0, %v733_v21 }
 0x19b   : >> { %v751_v41 = vmul.f32 %v2965_v26, %v743_v33  ;;  %v3026_v33 = vld [vmem:[%s3337_s1 + $0x5] ss:$0 sm:$0xff] }
 0x19d   : >> { %v864_v47 = vpack.c.bf16 %v751_v41, %v750_v40 }
 0x1a1   : >> { %v711_v22 = vpop.permute.xlu2 %710 }
 0x1a2   : >> { %v720_v56 = vsel %vm470_vm3, 0.0, %v711_v22 }
 0x1a3   : >> { %v728_v63 = vmul.f32 %v2997_v55, %v720_v56 }
 0x1a8   : >> { %v815_v23 = vpop.permute.xlu1 %814  ;;  %v735_v24 = vpop.permute.xlu0 %734 }
 0x1a9   : >> { %v793_v25 = vpop.permute.xlu2 %792  ;;  %v824_v28 = vsel %vm505_vm10, %v815_v23, 0.0  ;;  %v744_v29 = vsel %vm478_vm4, 0.0, %v735_v24 }
 0x1aa   : >> { %v832_v36 = vmul.f32 %v2970_v27, %v824_v28  ;;  %v752_v37 = vmul.f32 %v2965_v26, %v744_v29  ;;  %v801_v54 = vsel %vm497_vm5, %v793_v25, 0.0 }
 0x1ab   : >> { %v809_v57 = vmul.f32 %v2991_v53, %v801_v54 }
 0x1b0   : >> { %v817_v30 = vpop.permute.xlu1 %816  ;;  %v737_v31 = vpop.permute.xlu0 %736 }
 0x1b1   : >> { %v825_v34 = vsel %vm505_vm10, %v817_v30, 0.0  ;;  %v745_v35 = vsel %vm478_vm4, 0.0, %v737_v31  ;;  %v787_v44 = vpop.permute.xlu2 %786 }
 0x1b2   : >> { %v833_v38 = vmul.f32 %v2970_v27, %v825_v34  ;;  %v753_v39 = vmul.f32 %v2965_v26, %v745_v35  ;;  %v798_v17 = vsel %vm497_vm5, %v787_v44, 0.0 }
 0x1b3   : >> { %v806_v25 = vmul.f32 %v2991_v53, %v798_v17 }
 0x1b4   : >> { %v865_v42 = vpack.c.bf16 %v753_v39, %v752_v37  ;;  %v873_v43 = vpack.c.bf16 %v833_v38, %v832_v36 }
 0x1b6   : >> { %933 = vmatpush.bf16.msra.mxu0 %v865_v42  ;;  %952 = vmatpush.bf16.msra.mxu1 %v873_v43  ;;  %v3038_v43 = vld [vmem:[%s3337_s1 + $0x4] ss:$0 sm:$0xff] }
 0x1b8   : >> { %v813_v45 = vpop.permute.xlu1 %812  ;;  %v811_v46 = vpop.permute.xlu0 %810 }
 0x1b9   : >> { %v823_v48 = vsel %vm505_vm10, %v813_v45, 0.0  ;;  %v822_v49 = vsel %vm505_vm10, %v811_v46, 0.0  ;;  %v689_v62 = vpop.permute.xlu2 %688 }
 0x1ba   : >> { %v831_v50 = vmul.f32 %v2970_v27, %v823_v48  ;;  %v830_v51 = vmul.f32 %v2970_v27, %v822_v49  ;;  %934 = vmatpush.bf16.msra.mxu0 %v864_v47  ;;  %v697_v16 = vsel %vm462_vm0, 0.0, %v689_v62 }
 0x1bb   : >> { %v705_v20 = vmul.f32 %v3013_v15, %v697_v16 }
 0x1bc   : >> { %v872_v52 = vpack.c.bf16 %v831_v50, %v830_v51  ;;  %v760_v51 = vmul.f32 %v2662_v9, %v3038_v43 }
 0x1be   : >> { %953 = vmatpush.bf16.msra.mxu1 %v872_v52  ;;  %v650_v52 = vld [vmem:[%s3043_s13] sm:$0xff] }
 0x1c0   : >> { %v791_v58 = vpop.permute.xlu1 %790  ;;  %v713_v59 = vpop.permute.xlu0 %712 }
 0x1c1   : >> { %v800_v60 = vsel %vm497_vm5, %v791_v58, 0.0  ;;  %v721_v61 = vsel %vm470_vm3, 0.0, %v713_v59  ;;  %v683_v13 = vpop.permute.xlu2 %682  ;;  %v2700_v58 = vmov 0  }
 0x1c2   : >> { %v808_v0 = vmul.f32 %v2991_v53, %v800_v60  ;;  %v729_v1 = vmul.f32 %v2997_v55, %v721_v61  ;;  %v694_v41 = vsel %vm462_vm0, 0.0, %v683_v13  ;;  %2549 = vset.pattern.permute.xlu1 %v2700_v58  ;;  %2548 = vset.pattern.permute.xlu0 %v2700_v58  ;;  %v3060_v61 = vld [vmem:[%s3337_s1 + $0x8] ss:$0 sm:$0xff]  ;;  %v2108_v13 = vld [vmem:[%s3070_s28 + $0xc] sm:$0xf0] }
 0x1c3   : >> { %v702_v45 = vmul.f32 %v3013_v15, %v694_v41  ;;  %878 = vperm.xlu1 %2549, %v650_v52   ;;  %2547 = vset.pattern.permute.xlu2 %v2700_v58  ;;  %v2391_v58 = vld [vmem:[%s3070_s28 + $0x28] sm:$0xf0] }
 0x1c4   : >> { %v863_v2 = vpack.c.bf16 %v729_v1, %v728_v63  ;;  %v871_v3 = vpack.c.bf16 %v809_v57, %v808_v0  ;;  %v761_v57 = vmul.f32 %v2658_v18, %v3038_v43  ;;  %v758_v63 = vmul.f32 %v2670_v8, %v3038_v43 }
 0x1c5   : >> { %v759_v0 = vmul.f32 %v2666_v19, %v3038_v43 }
 0x1c6   : >> { %935 = vmatpush.bf16.msra.mxu0 %v863_v2  ;;  %954 = vmatpush.bf16.msra.mxu1 %v871_v3  ;;  %v867_v62 = vpack.c.bf16 %v761_v57, %v760_v51  ;;  %v2120_v51 = vld [vmem:[%s3070_s28 + $0x24] sm:$0xf0]  ;;  %v2126_v57 = vld [vmem:[%s3070_s28 + $0x20] sm:$0xf] }
 0x1c8   : >> { %v709_v4 = vpop.permute.xlu1 %708  ;;  %v707_v6 = vpop.permute.xlu0 %706 }
 0x1c9   : >> { %v719_v7 = vsel %vm470_vm3, 0.0, %v709_v4  ;;  %v718_v10 = vsel %vm470_vm3, 0.0, %v707_v6  ;;  %v765_v32 = vpop.permute.xlu2 %764 }
 0x1ca   : >> { %v727_v11 = vmul.f32 %v2997_v55, %v719_v7  ;;  %v726_v12 = vmul.f32 %v2997_v55, %v718_v10  ;;  %v775_v42 = vsel %vm489_vm2, %v765_v32, 0.0 }
 0x1cb   : >> { %v783_v46 = vmul.f32 %v3026_v33, %v775_v42 }
 0x1cc   : >> { %v862_v14 = vpack.c.bf16 %v727_v11, %v726_v12  ;;  %v866_v11 = vpack.c.bf16 %v759_v0, %v758_v63  ;;  %v2386_v12 = vld [vmem:[%s3070_s28 + $0x4] sm:$0xf] }
 0x1cd   : >> { %v2111_v17 = vor.u32 %v2386_v12, %v2108_v13 }
 0x1ce   : >> { %936 = vmatpush.bf16.msra.mxu0 %v862_v14 }
 0x1d0   : >> { %v687_v21 = vpop.permute.xlu1 %686  ;;  %v789_v22 = vpop.permute.xlu0 %788 }
 0x1d1   : >> { %v696_v23 = vsel %vm462_vm0, 0.0, %v687_v21  ;;  %v799_v24 = vsel %vm497_vm5, %v789_v22, 0.0  ;;  %v663_v44 = vpop.permute.xlu2 %662 }
 0x1d2   : >> { %v704_v28 = vmul.f32 %v3013_v15, %v696_v23  ;;  %v807_v29 = vmul.f32 %v2991_v53, %v799_v24  ;;  %v672_v21 = vsel %vm455_vm1, 0.0, %v663_v44 }
 0x1d4   : >> { %v861_v30 = vpack.c.bf16 %v705_v20, %v704_v28  ;;  %v870_v31 = vpack.c.bf16 %v807_v29, %v806_v25  ;;  %v3078_v20 = vld [vmem:[%s3337_s1] ss:$0 sm:$0xff]  ;;  %v652_v29 = vld [vmem:[%s3043_s13 + $0x10] sm:$0xff] }
 0x1d5   : >> { %888 = vperm.xlu2 %2547, %v652_v29  }
 0x1d6   : >> { %937 = vmatpush.bf16.msra.mxu0 %v861_v30  ;;  %955 = vmatpush.bf16.msra.mxu1 %v870_v31  ;;  %v653_v30 = vld [vmem:[%s3043_s13 + $0x18] sm:$0xff]  ;;  %v680_v31 = vmul.f32 %v3078_v20, %v672_v21 }
 0x1d7   : >> { %893 = vperm.xlu0 %2548, %v653_v30  }
 0x1d8   : >> { %v769_v34 = vpop.permute.xlu1 %768  ;;  %v767_v35 = vpop.permute.xlu0 %766 }
 0x1d9   : >> { %v777_v36 = vsel %vm489_vm2, %v769_v34, 0.0  ;;  %v776_v37 = vsel %vm489_vm2, %v767_v35, 0.0  ;;  %v837_v10 = vpop.permute.xlu2 %836  ;;  %v2114_v35 = vld [vmem:[%s3070_s28 + $0x8] sm:$0xf] }
 0x1da   : >> { %v785_v38 = vmul.f32 %v3026_v33, %v777_v36  ;;  %v784_v39 = vmul.f32 %v3026_v33, %v776_v37  ;;  %v847_v16 = vsel %vm513_vm11, %v837_v10, 0.0  ;;  %v2388_v36 = vld [vmem:[%s3070_s28 + $0x10] sm:$0xf0] }
 0x1db   : >> { %v855_v22 = vmul.f32 %v3060_v61, %v847_v16 }
 0x1dc   : >> { %v869_v40 = vpack.c.bf16 %v785_v38, %v784_v39  ;;  %v2115_v39 = vor.u32 %v2388_v36, %v2114_v35 }
 0x1de   : >> { %956 = vmatpush.bf16.msra.mxu1 %v869_v40  ;;  %v651_v40 = vld [vmem:[%s3043_s13 + $0x8] sm:$0xff] }
 0x1df   : >> { %883 = vperm.xlu2 %2547, %v651_v40  }
 0x1e0   : >> { %v763_v47 = vpop.permute.xlu1 %762  ;;  %v685_v48 = vpop.permute.xlu0 %684 }
 0x1e1   : >> { %v774_v49 = vsel %vm489_vm2, %v763_v47, 0.0  ;;  %v695_v50 = vsel %vm462_vm0, 0.0, %v685_v48 }
 0x1e2   : >> { %v782_v54 = vmul.f32 %v3026_v33, %v774_v49  ;;  %v703_v56 = vmul.f32 %v3013_v15, %v695_v50  ;;  %v2387_v49 = vld [vmem:[%s3070_s28 + $0x8] sm:$0xf0]  ;;  %v2389_v50 = vld [vmem:[%s3070_s28 + $0x1c] sm:$0xf] }
 0x1e4   : >> { %v860_v59 = vpack.c.bf16 %v703_v56, %v702_v45  ;;  %v868_v60 = vpack.c.bf16 %v783_v46, %v782_v54  ;;  %v2106_v46 = vld [vmem:[%s3070_s28] sm:$0xf]  ;;  %v2123_v56 = vor.u32 %v2389_v50, %v2120_v51  ;;  %v2145_v51 = vld [vmem:[%s3043_s13 + $0x38] sm:$0xff] }
 0x1e5   : >> { %v2107_v54 = vor.u32 %v2387_v49, %v2106_v46  ;;  %v2142_v50 = vld [vmem:[%s3043_s13 + $0x20] sm:$0xff] }
 0x1e6   : >> { %938 = vmatpush.bf16.msra.mxu0 %v860_v59  ;;  %957 = vmatpush.bf16.msra.mxu1 %v868_v60  ;;  %v2127_v59 = vor.u32 %v2391_v58, %v2126_v57  ;;  %v2118_v60 = vld [vmem:[%s3070_s28 + $0x18] sm:$0xf] }
 0x1e8   : >> { %v841_v1 = vpop.permute.xlu1 %840  ;;  %v839_v2 = vpop.permute.xlu0 %838 }
 0x1e9   : >> { %v849_v3 = vsel %vm513_vm11, %v841_v1, 0.0  ;;  %v848_v4 = vsel %vm513_vm11, %v839_v2, 0.0 }
 0x1ea   : >> { %v857_v6 = vmul.f32 %v3060_v61, %v849_v3  ;;  %v856_v7 = vmul.f32 %v3060_v61, %v848_v4  ;;  %958 = vmatpush.bf16.msra.mxu1 %v867_v62  ;;  %v2390_v62 = vld [vmem:[%s3070_s28 + $0x20] sm:$0xf0] }
 0x1eb   : >> { %v2119_v63 = vor.u32 %v2390_v62, %v2118_v60 }
 0x1ec   : >> { %v875_v14 = vpack.c.bf16 %v857_v6, %v856_v7 }
 0x1ee   : >> { %977 = vmatpush.bf16.msra.mxu2 %v875_v14  ;;  %959 = vmatpush.bf16.msra.mxu1 %v866_v11 }
 0x1f0   : >> { %v835_v23 = vpop.permute.xlu1 %834  ;;  %v665_v24 = vpop.permute.xlu0 %664 }
 0x1f1   : >> { %v846_v25 = vsel %vm513_vm11, %v835_v23, 0.0  ;;  %v673_v28 = vsel %vm455_vm1, 0.0, %v665_v24  ;;  %960 = vmatmul.bf16.vlgmr.msra.gmra.mxu1 %v2111_v17 }
 0x1f2   : >> { %v854_v32 = vmul.f32 %v3060_v61, %v846_v25  ;;  %v681_v34 = vmul.f32 %v3078_v20, %v673_v28 }
 0x1f4   : >> { %v859_v37 = vpack.c.bf16 %v681_v34, %v680_v31  ;;  %v874_v38 = vpack.c.bf16 %v855_v22, %v854_v32 }
 0x1f6   : >> { %939 = vmatpush.bf16.msra.mxu0 %v859_v37  ;;  %978 = vmatpush.bf16.msra.mxu2 %v874_v38 }
 0x1f8   : >> { %v661_v41 = vpop.permute.xlu1 %660  ;;  %v659_v42 = vpop.permute.xlu0 %658 }
 0x1f9   : >> { %v671_v44 = vsel %vm455_vm1, 0.0, %v661_v41  ;;  %v670_v45 = vsel %vm455_vm1, 0.0, %v659_v42  ;;  %2128 = vmatmul.msk.bf16.vlgmr.msra.gmra.mxu2 %vm926_vm12, %v2115_v39 }
 0x1fa   : >> { %v679_v47 = vmul.f32 %v3078_v20, %v671_v44  ;;  %v678_v48 = vmul.f32 %v3078_v20, %v670_v45 }
 0x1fc   : >> { %v858_v52 = vpack.c.bf16 %v679_v47, %v678_v48 }
 0x1fe   : >> { %940 = vmatpush.bf16.msra.mxu0 %v858_v52  ;;  %v2143_v52 = vld [vmem:[%s3043_s13 + $0x28] sm:$0xff] }
 0x201   : >> { %941 = vmatmul.bf16.vlgmr.msra.gmra.mxu0 %v2107_v54  ;;  %965 = vmatmul.bf16.gmra.mxu1 %v2123_v56  ;;  %v2144_v54 = vld [vmem:[%s3043_s13 + $0x30] sm:$0xff] }
 0x209   : >> { %2129 = vmatmul.msk.bf16.gmra.mxu2 %vm926_vm12, %v2127_v59 }
 0x211   : >> { %946 = vmatmul.bf16.gmra.mxu0 %v2119_v63 }
 0x22f   : >> { %v889_v1 = vpop.permute.xlu2 %888 }
 0x235   : >> { %v879_v3 = vpop.permute.xlu1 %878 }
 0x239   : >> { %v884_v12 = vpop.permute.xlu2 %883 }
 0x249   : >> { %v894_v34 = vpop.permute.xlu0 %893 }
 0x26e   : >> { %v961_v0 = vpop.f32.mrf.mxu1 }
 0x276   : >> { %v963_v11 = vpop.f32.mrf.mxu1 }
 0x27c   : >> { %v980_v2 = vpop.f32.mrf.mxu2 }
 0x27e   : >> { %v942_v4 = vpop.f32.mrf.mxu0  ;;  %v966_v24 = vpop.f32.mrf.mxu1 }
 0x27f   : >> { %v943_v6 = vadd.f32 %v942_v4, %v879_v3 }
 0x281   : >> { %v962_v7 = vadd.f32 %v961_v0, %v943_v6 }
 0x283   : >> { %v981_v10 = vadd.f32 %v980_v2, %v962_v7 }
 0x284   : >> { %v982_v14 = vpop.f32.mrf.mxu2 }
 0x285   : >> { %vm990_vm13 = vcmp.gt.f32.partialorder %v981_v10, 0.0  ;;  %v994_v13 = vmul.f32 0.01, %v981_v10 }
 0x286   : >> { %v944_v16 = vpop.f32.mrf.mxu0  ;;  %v968_v37 = vpop.f32.mrf.mxu1 }
 0x287   : >> { %v3106_v17 = vsel %vm990_vm13, %v981_v10, %v994_v13  ;;  %v945_v21 = vadd.f32 %v944_v16, %v884_v12 }
 0x288   : >> { %1128 = vrot.lane.b32.xlu0 %v3106_v17, %s2695_s20  ;;  %1148 = vrot.lane.b32.xlu1 %v3106_v17, %s2692_s24 }
 0x289   : >> { %v964_v22 = vadd.f32 %v963_v11, %v945_v21  ;;  %1084 = vrot.lane.b32.xlu2 %v3106_v17, %s2693_s18 }
 0x28b   : >> { %v983_v23 = vadd.f32 %v982_v14, %v964_v22 }
 0x28c   : >> { %v985_v29 = vpop.f32.mrf.mxu2 }
 0x28d   : >> { %vm991_vm14 = vcmp.gt.f32.partialorder %v983_v23, 0.0  ;;  %v995_v25 = vmul.f32 0.01, %v983_v23 }
 0x28e   : >> { %v947_v28 = vpop.f32.mrf.mxu0 }
 0x28f   : >> { %v3114_v30 = vsel %vm991_vm14, %v983_v23, %v995_v25  ;;  %v948_v31 = vadd.f32 %v947_v28, %v889_v1 }
 0x290   : >> { %1044 = vrot.lane.b32.xlu0 %v3106_v17, %s2696_s21  ;;  %1064 = vrot.lane.b32.xlu1 %v3106_v17, %s2694_s19 }
 0x291   : >> { %v967_v32 = vadd.f32 %v966_v24, %v948_v31  ;;  %1150 = vrot.lane.b32.xlu2 %v3114_v30, %s2692_s24 }
 0x293   : >> { %v986_v35 = vadd.f32 %v985_v29, %v967_v32 }
 0x294   : >> { %v987_v39 = vpop.f32.mrf.mxu2 }
 0x295   : >> { %v996_v40 = vmul.f32 0.01, %v986_v35  ;;  %vm992_vm15 = vcmp.gt.f32.partialorder %v986_v35, 0.0 }
 0x296   : >> { %v949_v36 = vpop.f32.mrf.mxu0 }
 0x297   : >> { %v950_v38 = vadd.f32 %v949_v36, %v894_v34  ;;  %v1000_v44 = vsel %vm992_vm15, %v986_v35, %v996_v40 }
 0x298   : >> { %1086 = vrot.lane.b32.xlu0 %v3114_v30, %s2693_s18  ;;  %1130 = vrot.lane.b32.xlu1 %v3114_v30, %s2695_s20  ;;  %v3131_v47 = vmul.f32 %v3038_v43, %v1000_v44 }
 0x299   : >> { %v969_v41 = vadd.f32 %v968_v37, %v950_v38  ;;  %1066 = vrot.lane.b32.xlu2 %v3114_v30, %s2694_s19 }
 0x29b   : >> { %v988_v42 = vadd.f32 %v987_v39, %v969_v41 }
 0x29d   : >> { %vm993_vm7 = vcmp.gt.f32.partialorder %v988_v42, 0.0  ;;  %v997_v45 = vmul.f32 0.01, %v988_v42 }
 0x29f   : >> { %v1001_v46 = vsel %vm993_vm7, %v988_v42, %v997_v45 }
 0x2a0   : >> { %1152 = vrot.lane.b32.xlu0 %v1000_v44, %s2692_s24  ;;  %1088 = vrot.lane.b32.xlu1 %v1000_v44, %s2693_s18  ;;  %v3134_v48 = vmul.f32 %v3038_v43, %v1001_v46 }
 0x2a1   : >> { %1132 = vrot.lane.b32.xlu2 %v1000_v44, %s2695_s20 }
 0x2a2   : >> { %v1197_v49 = vpack.c.bf16 %v3134_v48, %v3131_v47 }
 0x2a8   : >> { %1068 = vrot.lane.b32.xlu0 %v1000_v44, %s2694_s19  ;;  %1112 = vrot.lane.b32.xlu1 %v1000_v44, %s2697_s22 }
 0x2a9   : >> { %1048 = vrot.lane.b32.xlu2 %v1000_v44, %s2696_s21 }
 0x2b0   : >> { %1134 = vrot.lane.b32.xlu0 %v1001_v46, %s2695_s20  ;;  %1154 = vrot.lane.b32.xlu1 %v1001_v46, %s2692_s24 }
 0x2b1   : >> { %1090 = vrot.lane.b32.xlu2 %v1001_v46, %s2693_s18 }
 0x2b8   : >> { %1050 = vrot.lane.b32.xlu0 %v1001_v46, %s2696_s21  ;;  %1070 = vrot.lane.b32.xlu1 %v1001_v46, %s2694_s19 }
 0x2b9   : >> { %1108 = vrot.lane.b32.xlu2 %v3106_v17, %s2697_s22 }
 0x2c0   : >> { %1110 = vrot.lane.b32.xlu0 %v3114_v30, %s2697_s22  ;;  %1046 = vrot.lane.b32.xlu1 %v3114_v30, %s2696_s21 }
 0x2c1   : >> { %1114 = vrot.lane.b32.xlu2 %v1001_v46, %s2697_s22 }
 0x2c8   : >> { %1024 = vrot.lane.b32.xlu0 %v3106_v17, %s2699_s26  ;;  %1028 = vrot.lane.b32.xlu1 %v1000_v44, %s2699_s26 }
 0x2c9   : >> { %1030 = vrot.lane.b32.xlu2 %v1001_v46, %s2699_s26 }
 0x2d0   : >> { %1174 = vrot.lane.b32.xlu0 %v1001_v46, %s2698_s25  ;;  %1026 = vrot.lane.b32.xlu1 %v3114_v30, %s2699_s26 }
 0x2d1   : >> { %1172 = vrot.lane.b32.xlu2 %v1000_v44, %s2698_s25 }
 0x2d8   : >> { %1208 = vperm.xlu0 %2548, %v2142_v50   ;;  %1168 = vrot.lane.b32.xlu1 %v3106_v17, %s2698_s25 }
 0x2d9   : >> { %1170 = vrot.lane.b32.xlu2 %v3114_v30, %s2698_s25 }
 0x2e0   : >> { %1223 = vperm.xlu0 %2548, %v2145_v51   ;;  %1213 = vperm.xlu1 %2549, %v2143_v52  }
 0x2e1   : >> { %1218 = vperm.xlu2 %2547, %v2144_v54  }
 0x2e3   : >> { %v1085_v56 = vpop.permute.xlu2 %1084 }
 0x2e4   : >> { %v1096_v16 = vsel %vm478_vm4, 0.0, %v1085_v56 }
 0x2e5   : >> { %v1100_v23 = vmul.f32 %v2965_v26, %v1096_v16 }
 0x2e8   : > { %2559 = vset.pattern.permute.xlu0 (%p628_p7), %v2690_v5 }
 0x2eb   : >> { %v1151_v57 = vpop.permute.xlu2 %1150 }
 0x2f3   : >> { %v1067_v58 = vpop.permute.xlu2 %1066 }
 0x2fa   : >> { %v1129_v59 = vpop.permute.xlu0 %1128  ;;  %v1149_v60 = vpop.permute.xlu1 %1148 }
 0x2fb   : >> { %v1133_v62 = vpop.permute.xlu2 %1132  ;;  %v1160_v35 = vsel %vm505_vm10, %v1149_v60, 0.0 }
 0x2fc   : >> { %v1164_v39 = vmul.f32 %v2970_v27, %v1160_v35  ;;  %v1142_v45 = vsel %vm497_vm5, %v1133_v62, 0.0 }
 0x302   : >> { %v3170_v63 = vpop.permute.xlu0 %1044  ;;  %v1065_v0 = vpop.permute.xlu1 %1064 }
 0x303   : >> { %v1049_v1 = vpop.permute.xlu2 %1048  ;;  %v1076_v50 = vsel %vm470_vm3, 0.0, %v1065_v0  ;;  %v1140_v0 = vsel %vm497_vm5, %v1129_v59, 0.0 }
 0x304   : >> { %v1058_v59 = vsel %vm462_vm0, 0.0, %v1049_v1  ;;  %v1056_v1 = vsel %vm462_vm0, 0.0, %v3170_v63 }
 0x30a   : >> { %v1087_v2 = vpop.permute.xlu0 %1086  ;;  %v1131_v3 = vpop.permute.xlu1 %1130 }
 0x30b   : >> { %v1091_v4 = vpop.permute.xlu2 %1090  ;;  %v1097_v11 = vsel %vm478_vm4, 0.0, %v1087_v2  ;;  %v1077_v2 = vsel %vm470_vm3, 0.0, %v1067_v58 }
 0x30c   : >> { %v1099_v6 = vsel %vm478_vm4, 0.0, %v1091_v4  ;;  %v1101_v21 = vmul.f32 %v2965_v26, %v1097_v11 }
 0x30d   : >> { %v1103_v13 = vmul.f32 %v2965_v26, %v1099_v6  ;;  %v1080_v6 = vmul.f32 %v2997_v55, %v1076_v50 }
 0x30e   : >> { %v1194_v28 = vpack.c.bf16 %v1101_v21, %v1100_v23 }
 0x312   : >> { %v1153_v7 = vpop.permute.xlu0 %1152  ;;  %v1089_v10 = vpop.permute.xlu1 %1088 }
 0x313   : >> { %v1098_v12 = vsel %vm478_vm4, 0.0, %v1089_v10  ;;  %v1109_v29 = vpop.permute.xlu2 %1108  ;;  %v1162_v31 = vsel %vm505_vm10, %v1153_v7, 0.0 }
 0x314   : >> { %v1102_v14 = vmul.f32 %v2965_v26, %v1098_v12  ;;  %v1166_v37 = vmul.f32 %v2970_v27, %v1162_v31  ;;  %v1161_v26 = vsel %vm505_vm10, %v1151_v57, 0.0  ;;  %v1141_v57 = vsel %vm497_vm5, %v1131_v3, 0.0 }
 0x315   : >> { %v1165_v44 = vmul.f32 %v2970_v27, %v1161_v26  ;;  %v1145_v7 = vmul.f32 %v2991_v53, %v1141_v57  ;;  %v1081_v3 = vmul.f32 %v2997_v55, %v1077_v2  ;;  %v1060_v26 = vmul.f32 %v3013_v15, %v1056_v1 }
 0x316   : >> { %v1195_v22 = vpack.c.bf16 %v1103_v13, %v1102_v14  ;;  %v1144_v14 = vmul.f32 %v2991_v53, %v1140_v0  ;;  %v2394_v0 = vld [vmem:[%s3070_s28 + $0x38] sm:$0xf0] }
 0x317   : >> { %v1202_v56 = vpack.c.bf16 %v1165_v44, %v1164_v39  ;;  %v1192_v21 = vpack.c.bf16 %v1081_v3, %v1080_v6 }
 0x318   : >> { %1262 = vmatpush.bf16.msra.mxu3 %v1195_v22 }
 0x31a   : >> { %v1069_v24 = vpop.permute.xlu0 %1068  ;;  %v1113_v25 = vpop.permute.xlu1 %1112 }
 0x31b   : >> { %v1115_v41 = vpop.permute.xlu2 %1114  ;;  %v1078_v46 = vsel %vm470_vm3, 0.0, %v1069_v24  ;;  %v1122_v12 = vsel %vm489_vm2, %v1113_v25, 0.0 }
 0x31c   : >> { %1263 = vmatpush.bf16.msra.mxu3 %v1194_v28  ;;  %v1082_v4 = vmul.f32 %v2997_v55, %v1078_v46  ;;  %v1123_v58 = vsel %vm489_vm2, %v1115_v41, 0.0  ;;  %v1126_v22 = vmul.f32 %v3026_v33, %v1122_v12  ;;  %v1200_v28 = vpack.c.bf16 %v1145_v7, %v1144_v14 }
 0x31d   : >> { %v1127_v23 = vmul.f32 %v3026_v33, %v1123_v58  ;;  %v2156_v58 = vld [vmem:[%s3070_s28 + $0x38] sm:$0xf] }
 0x322   : >> { %v1135_v32 = vpop.permute.xlu0 %1134  ;;  %v1155_v34 = vpop.permute.xlu1 %1154 }
 0x323   : >> { %v1163_v36 = vsel %vm505_vm10, %v1155_v34, 0.0  ;;  %v1143_v42 = vsel %vm497_vm5, %v1135_v32, 0.0  ;;  %v1031_v16 = vpop.permute.xlu2 %1030  ;;  %v1120_v34 = vsel %vm489_vm2, %v1109_v29, 0.0 }
 0x324   : >> { %v1167_v38 = vmul.f32 %v2970_v27, %v1163_v36  ;;  %v1147_v51 = vmul.f32 %v2991_v53, %v1143_v42  ;;  %v1146_v27 = vmul.f32 %v2991_v53, %v1142_v45  ;;  %v1062_v53 = vmul.f32 %v3013_v15, %v1058_v59  ;;  %v2395_v59 = vld [vmem:[%s3070_s28 + $0x40] sm:$0xf0] }
 0x325   : >> { %v1124_v39 = vmul.f32 %v3026_v33, %v1120_v34 }
 0x326   : >> { %v1203_v40 = vpack.c.bf16 %v1167_v38, %v1166_v37  ;;  %v1201_v11 = vpack.c.bf16 %v1147_v51, %v1146_v27  ;;  %v1199_v38 = vpack.c.bf16 %v1127_v23, %v1126_v22  ;;  %v1104_v51 = vmul.f32 %v3038_v43, %v3106_v17 }
 0x327   : >> { %v2157_v23 = vor.u32 %v2395_v59, %v2156_v58  ;;  %v2217_v59 = vld [vmem:[#allocation5 + $0x50] sm:$0xf] (%p628_p7) }
 0x328   : >> { %1281 = vmatpush.bf16.msrb.mxu2 %v1203_v40  ;;  %v1039_v40 = vsel %vm455_vm1, 0.0, %v1031_v16  ;;  %v2168_v16 = vld [vmem:[%s3070_s28 + $0x50] sm:$0xf] }
 0x329   : >> { %v1043_v45 = vmul.f32 %v3078_v20, %v1039_v40 }
 0x32a   : >> { %v1051_v52 = vpop.permute.xlu0 %1050  ;;  %v1071_v54 = vpop.permute.xlu1 %1070 }
 0x32b   : >> { %v1079_v60 = vsel %vm470_vm3, 0.0, %v1071_v54  ;;  %v1059_v13 = vsel %vm462_vm0, 0.0, %v1051_v52  ;;  %v1173_v46 = vpop.permute.xlu2 %1172  ;;  %v2393_v52 = vld [vmem:[%s3070_s28 + $0x34] sm:$0xf]  ;;  %v2150_v54 = vld [vmem:[%s3070_s28 + $0x3c] sm:$0xf0] }
 0x32c   : >> { %v1083_v62 = vmul.f32 %v2997_v55, %v1079_v60  ;;  %1282 = vmatpush.bf16.msrb.mxu2 %v1202_v56  ;;  %v1063_v55 = vmul.f32 %v3013_v15, %v1059_v13  ;;  %v1182_v56 = vsel %vm513_vm11, %v1173_v46, 0.0  ;;  %v2153_v47 = vor.u32 %v2393_v52, %v2150_v54 }
 0x32d   : >> { %v1186_v48 = vmul.f32 %v3060_v61, %v1182_v56  ;;  %vm1968_vm3 = vcmask (%p628_p7), 0  }
 0x32e   : >> { %v1193_v10 = vpack.c.bf16 %v1083_v62, %v1082_v4  ;;  %v1191_v37 = vpack.c.bf16 %v1063_v55, %v1062_v53  ;;  %v2148_v62 = vld [vmem:[%s3070_s28 + $0x30] sm:$0xf] }
 0x330   : >> { %1264 = vmatpush.bf16.msra.mxu3 %v1193_v10  ;;  %1283 = vmatpush.bf16.msrb.mxu2 %v1201_v11  ;;  %v2149_v11 = vor.u32 %v2394_v0, %v2148_v62 }
 0x332   : >> { %v1111_v24 = vpop.permute.xlu0 %1110  ;;  %v1047_v25 = vpop.permute.xlu1 %1046 }
 0x333   : >> { %v1121_v31 = vsel %vm489_vm2, %v1111_v24, 0.0  ;;  %v1057_v32 = vsel %vm462_vm0, 0.0, %v1047_v25  ;;  %v1171_v6 = vpop.permute.xlu2 %1170  ;;  %v2396_v24 = vld [vmem:[%s3070_s28 + $0x4c] sm:$0xf]  ;;  %v2162_v25 = vld [vmem:[%s3070_s28 + $0x54] sm:$0xf0] }
 0x334   : >> { %1265 = vmatpush.bf16.msra.mxu3 %v1192_v21  ;;  %1284 = vmatpush.bf16.msrb.mxu2 %v1200_v28  ;;  %v1125_v35 = vmul.f32 %v3026_v33, %v1121_v31  ;;  %v1061_v36 = vmul.f32 %v3013_v15, %v1057_v32  ;;  %v1105_v33 = vmul.f32 %v3038_v43, %v3114_v30  ;;  %v1181_v3 = vsel %vm513_vm11, %v1171_v6, 0.0  ;;  %v2398_v21 = vld [vmem:[%s3070_s28 + $0x58] sm:$0xf0]  ;;  %v2160_v31 = vld [vmem:[%s3070_s28 + $0x48] sm:$0xf] }
 0x335   : >> { %v1185_v13 = vmul.f32 %v3060_v61, %v1181_v3  ;;  %v2169_v55 = vor.u32 %v2398_v21, %v2168_v16  ;;  %v2165_v28 = vor.u32 %v2396_v24, %v2162_v25  ;;  %v2397_v32 = vld [vmem:[%s3070_s28 + $0x50] sm:$0xf0]  ;;  %v2405_v3 = vld [vmem:[#allocation5 + $0x24] sm:$0xf0] (%p628_p7)  ;;  %v2411_v16 = vld [vmem:[#allocation5 + $0x54] sm:$0xf0] (%p628_p7) }
 0x336   : >> { %v1190_v42 = vpack.c.bf16 %v1061_v36, %v1060_v26  ;;  %v1198_v29 = vpack.c.bf16 %v1125_v35, %v1124_v39  ;;  %v1196_v27 = vpack.c.bf16 %v1105_v33, %v1104_v51  ;;  %v2161_v53 = vor.u32 %v2397_v32, %v2160_v31  ;;  %v2410_v21 = vld [vmem:[#allocation5 + $0x54] sm:$0xf] (%p628_p7)  ;;  %v2209_v32 = vld [vmem:[#allocation5 + $0x40] sm:$0xf] (%p628_p7) }
 0x337   : > { %v2402_v24 = vld [vmem:[#allocation5 + $0x14] sm:$0xf] (%p628_p7) }
 0x338   : >> { %1266 = vmatpush.bf16.msra.mxu3 %v1191_v37  ;;  %1285 = vmatpush.bf16.msrb.mxu2 %v1199_v38 }
 0x33a   : >> { %v1025_v41 = vpop.permute.xlu0 %1024  ;;  %v1029_v63 = vpop.permute.xlu1 %1028 }
 0x33b   : >> { %v1038_v44 = vsel %vm455_vm1, 0.0, %v1029_v63  ;;  %v1036_v57 = vsel %vm455_vm1, 0.0, %v1025_v41 }
 0x33c   : >> { %v1042_v50 = vmul.f32 %v3078_v20, %v1038_v44  ;;  %1267 = vmatpush.bf16.msra.mxu3 %v1190_v42  ;;  %1286 = vmatpush.bf16.msrb.mxu2 %v1198_v29  ;;  %v1040_v43 = vmul.f32 %v3078_v20, %v1036_v57 }
 0x33e   : >> { %v1189_v15 = vpack.c.bf16 %v1043_v45, %v1042_v50  ;;  %v1219_v50 = vpop.permute.xlu2 %1218 }
 0x340   : >> { %1268 = vmatpush.bf16.msra.mxu3 %v1189_v15  ;;  %1287 = vmatpush.bf16.msrb.mxu2 %v1197_v49 }
 0x342   : >> { %v1175_v60 = vpop.permute.xlu0 %1174  ;;  %v1027_v2 = vpop.permute.xlu1 %1026 }
 0x343   : >> { %v1183_v30 = vsel %vm513_vm11, %v1175_v60, 0.0  ;;  %v1037_v4 = vsel %vm455_vm1, 0.0, %v1027_v2  ;;  %vm1402_vm1 = vcmask (%p628_p7), 392192  }
 0x344   : >> { %v1187_v17 = vmul.f32 %v3060_v61, %v1183_v30  ;;  %v1041_v49 = vmul.f32 %v3078_v20, %v1037_v4  ;;  %1288 = vmatpush.bf16.msrb.mxu2 %v1196_v27 }
 0x346   : >> { %v1188_v7 = vpack.c.bf16 %v1041_v49, %v1040_v43  ;;  %v1205_v10 = vpack.c.bf16 %v1187_v17, %v1186_v48 }
 0x347   : >> { %1289 = vmatmul.bf16.vlgmr.msrb.gmra.mxu2 %v2153_v47 }
 0x348   : >> { %1269 = vmatpush.bf16.msra.mxu3 %v1188_v7  ;;  %1306 = vmatpush.bf16.msrb.mxu0 %v1205_v10 }
 0x349   : >> { %2449 = vmatpush.bf16.msrb.mxu1 %v1205_v10  ;;  %v1338_v10 = vld [vmem:[%s3343_s7] sm:$0xff] (%p628_p7) }
 0x34a   : >> { %v1169_v20 = vpop.permute.xlu1 %1168  ;;  %v1209_v1 = vpop.permute.xlu0 %1208  ;;  %1341 = vperm.xlu0 (%p628_p7), %2559, %v1338_v10   ;;  %v2263_v10 = vld [vmem:[#allocation5 + $0xa8] sm:$0xf0] (%p628_p7) }
 0x34b   : >> { %v1180_v12 = vsel %vm513_vm11, %v1169_v20, 0.0  ;;  %1270 = vmatmul.bf16.vlgmr.msra.gmra.mxu3 %v2149_v11  ;;  %v2191_v11 = vld [vmem:[#allocation5 + $0x20] sm:$0xf] (%p628_p7)  ;;  %v2404_v20 = vld [vmem:[#allocation5 + $0x24] sm:$0xf] (%p628_p7) }
 0x34c   : >> { %v1184_v14 = vmul.f32 %v3060_v61, %v1180_v12  ;;  %v2193_v12 = vld [vmem:[#allocation5 + $0x28] sm:$0xf0] (%p628_p7) }
 0x34e   : >> { %v1204_v22 = vpack.c.bf16 %v1185_v13, %v1184_v14  ;;  %v2192_v13 = vor.u32 (%p628_p7), %v2405_v3, %v2191_v11  ;;  %v2196_v14 = vor.u32 (%p628_p7), %v2404_v20, %v2193_v12  ;;  %v2227_v11 = vld [vmem:[#allocation5 + $0x60] sm:$0xf] (%p628_p7)  ;;  %v2413_v3 = vld [vmem:[#allocation5 + $0x64] sm:$0xf0] (%p628_p7)  ;;  %v2253_v12 = vld [vmem:[#allocation5 + $0x90] sm:$0xf] (%p628_p7) }
 0x350   : >> { %1307 = vmatpush.bf16.msrb.mxu0 %v1204_v22  ;;  %2450 = vmatpush.bf16.msrb.mxu1 %v1204_v22  ;;  %v2218_v22 = vor.u32 (%p628_p7), %v2411_v16, %v2217_v59  ;;  %v2255_v59 = vld [vmem:[#allocation5 + $0x98] sm:$0xf0] (%p628_p7)  ;;  %v2228_v16 = vor.u32 (%p628_p7), %v2413_v3, %v2227_v11  ;;  %v2438_v3 = vld [vmem:[#allocation5 + $0x134] sm:$0xf] (%p628_p7) }
 0x351   : > { %1424 = vmatpush.bf16.msra.mxu2 (%p628_p7), %v2196_v14 }
 0x352   : >> { %v1214_v40 = vpop.permute.xlu1 %1213  ;;  %v1224_v27 = vpop.permute.xlu0 %1223  ;;  %1485 = vmatpush.bf16.msra.mxu3 (%p628_p7), %v2218_v22 }
 0x353   : >> { %2170 = vmatmul.msk.bf16.vlgmr.msrb.gmra.mxu0 %vm926_vm12, %v2157_v23  ;;  %2171 = vmatmul.msk.bf16.vlgmr.msrb.gmra.mxu1 %vm926_vm12, %v2169_v55  ;;  %v2183_v23 = vld [vmem:[#allocation5 + $0x10] sm:$0xf] (%p628_p7)  ;;  %v2403_v55 = vld [vmem:[#allocation5 + $0x14] sm:$0xf0] (%p628_p7) }
 0x354   : > { %1411 = vmatpush.bf16.msra.mxu1 (%p628_p7), %v2192_v13  ;;  %v2184_v25 = vor.u32 (%p628_p7), %v2403_v55, %v2183_v23  ;;  %v2418_v13 = vld [vmem:[#allocation5 + $0x94] sm:$0xf] (%p628_p7)  ;;  %v2297_v23 = vld [vmem:[#allocation5 + $0xe8] sm:$0xf0] (%p628_p7)  ;;  %v2295_v55 = vld [vmem:[#allocation5 + $0xe0] sm:$0xf] (%p628_p7) }
 0x357   : >> { %1294 = vmatmul.bf16.gmra.mxu2 %v2165_v28  ;;  %v2185_v28 = vld [vmem:[#allocation5 + $0x18] sm:$0xf0] (%p628_p7) }
 0x358   : > { %v2188_v31 = vor.u32 (%p628_p7), %v2402_v24, %v2185_v28  ;;  %1412 = vmatpush.bf16.msra.mxu1 (%p628_p7), %v2184_v25  ;;  %v2429_v24 = vld [vmem:[#allocation5 + $0xe4] sm:$0xf0] (%p628_p7)  ;;  %v2321_v28 = vld [vmem:[#allocation5 + $0x110] sm:$0xf] (%p628_p7) }
 0x35a   : > { %1425 = vmatpush.bf16.msra.mxu2 (%p628_p7), %v2188_v31  ;;  %v2435_v31 = vld [vmem:[#allocation5 + $0x114] sm:$0xf0] (%p628_p7) }
 0x35b   : >> { %1275 = vmatmul.bf16.gmra.mxu3 %v2161_v53  ;;  %v2409_v53 = vld [vmem:[#allocation5 + $0x44] sm:$0xf0] (%p628_p7) }
 0x3bc   : > { %v1342_v22 = vpop.permute.xlu0 (%p628_p7), %1341 }
 0x3ca   : >> { %v1290_v61 = vpop.f32.mrf.mxu2 }
 0x3ce   : >> { %v1271_v34 = vpop.f32.mrf.mxu3 }
 0x3cf   : >> { %v1272_v35 = vadd.f32 %v1271_v34, %v1209_v1  ;;  %v2210_v1 = vor.u32 (%p628_p7), %v2409_v53, %v2209_v32  ;;  %v2211_v34 = vld [vmem:[#allocation5 + $0x48] sm:$0xf0] (%p628_p7)  ;;  %v2434_v32 = vld [vmem:[#allocation5 + $0x114] sm:$0xf] (%p628_p7)  ;;  %v2323_v53 = vld [vmem:[#allocation5 + $0x118] sm:$0xf0] (%p628_p7) }
 0x3d0   : >> { %v1309_v36 = vpop.f32.mrf.mxu0  ;;  %v1314_v56 = vpop.f32.mrf.mxu1 }
 0x3d1   : >> { %v1291_v37 = vadd.f32 %v1290_v61, %v1272_v35  ;;  %v2408_v61 = vld [vmem:[#allocation5 + $0x44] sm:$0xf] (%p628_p7)  ;;  %1486 = vmatpush.bf16.msra.mxu3 (%p628_p7), %v2210_v1 }
 0x3d2   : >> { %v1292_v26 = vpop.f32.mrf.mxu2  ;;  %v2214_v35 = vor.u32 (%p628_p7), %v2408_v61, %v2211_v34  ;;  %v2296_v34 = vor.u32 (%p628_p7), %v2429_v24, %v2295_v55  ;;  %v2333_v55 = vld [vmem:[#allocation5 + $0x128] sm:$0xf0] (%p628_p7)  ;;  %v2331_v24 = vld [vmem:[#allocation5 + $0x120] sm:$0xf] (%p628_p7) }
 0x3d3   : >> { %v1310_v38 = vadd.f32 %v1309_v36, %v1291_v37  ;;  %v2175_v36 = vld [vmem:[#allocation5] sm:$0xf] (%p628_p7)  ;;  %v2401_v37 = vld [vmem:[#allocation5 + $0x4] sm:$0xf0] (%p628_p7) }
 0x3d5   : >> { %v1319_v39 = vadd.f32 %v2670_v8, %v1310_v38  ;;  %v2400_v38 = vld [vmem:[#allocation5 + $0x4] sm:$0xf] (%p628_p7) }
 0x3d6   : >> { %v1273_v41 = vpop.f32.mrf.mxu3 }
 0x3d7   : >> { %vm1323_vm8 = vcmp.gt.f32.partialorder %v1319_v39, 0.0  ;;  %v1327_v63 = vmul.f32 0.01, %v1319_v39  ;;  %v1274_v42 = vadd.f32 %v1273_v41, %v1214_v40  ;;  %v2201_v41 = vld [vmem:[#allocation5 + $0x30] sm:$0xf] (%p628_p7) }
 0x3d8   : >> { %v1311_v29 = vpop.f32.mrf.mxu0 }
 0x3d9   : >> { %v1331_v44 = vsel %vm1323_vm8, %v1319_v39, %v1327_v63   ;;  %v1293_v45 = vadd.f32 %v1292_v26, %v1274_v42  ;;  %v2176_v26 = vor.u32 (%p628_p7), %v2401_v37, %v2175_v36  ;;  %v2177_v39 = vld [vmem:[#allocation5 + $0x8] sm:$0xf0] (%p628_p7)  ;;  %v2407_v63 = vld [vmem:[#allocation5 + $0x34] sm:$0xf0] (%p628_p7)  ;;  %v2406_v42 = vld [vmem:[#allocation5 + $0x34] sm:$0xf] (%p628_p7) }
 0x3da   : >> { %v1295_v33 = vpop.f32.mrf.mxu2  ;;  %v2180_v40 = vor.u32 (%p628_p7), %v2400_v38, %v2177_v39  ;;  %v2289_v37 = vld [vmem:[#allocation5 + $0xd8] sm:$0xf0] (%p628_p7)  ;;  %v2287_v38 = vld [vmem:[#allocation5 + $0xd0] sm:$0xf] (%p628_p7)  ;;  %v2322_v39 = vor.u32 (%p628_p7), %v2435_v31, %v2321_v28 }
 0x3db   : >> { %v1312_v46 = vadd.f32 %v1311_v29, %v1293_v45  ;;  %1413 = vmatpush.bf16.msra.mxu1 (%p628_p7), %v2176_v26  ;;  %v2202_v29 = vor.u32 (%p628_p7), %v2407_v63, %v2201_v41  ;;  %v2427_v26 = vld [vmem:[#allocation5 + $0xd4] sm:$0xf0] (%p628_p7)  ;;  %v2313_v41 = vld [vmem:[#allocation5 + $0x100] sm:$0xf] (%p628_p7)  ;;  %v2433_v63 = vld [vmem:[#allocation5 + $0x104] sm:$0xf0] (%p628_p7) }
 0x3dc   : > { %1426 = vmatpush.bf16.msra.mxu2 (%p628_p7), %v2180_v40  ;;  %v2326_v40 = vor.u32 (%p628_p7), %v2434_v32, %v2323_v53  ;;  %v2357_v32 = vld [vmem:[#allocation5 + $0x150] sm:$0xf] (%p628_p7)  ;;  %v2443_v53 = vld [vmem:[#allocation5 + $0x154] sm:$0xf0] (%p628_p7) }
 0x3dd   : >> { %v1320_v15 = vadd.f32 %v2666_v19, %v1312_v46  ;;  %v1316_v19 = vpop.f32.mrf.mxu1  ;;  %1487 = vmatpush.bf16.msra.mxu3 (%p628_p7), %v2202_v29  ;;  %v2416_v46 = vld [vmem:[#allocation5 + $0x84] sm:$0xf] (%p628_p7) }
 0x3de   : >> { %v1276_v51 = vpop.f32.mrf.mxu3 }
 0x3df   : >> { %vm1324_vm9 = vcmp.gt.f32.partialorder %v1320_v15, 0.0  ;;  %v1328_v52 = vmul.f32 0.01, %v1320_v15  ;;  %v1277_v54 = vadd.f32 %v1276_v51, %v1219_v50  ;;  %v2245_v50 = vld [vmem:[#allocation5 + $0x88] sm:$0xf0] (%p628_p7) }
 0x3e0   : > { %v2423_v51 = vld [vmem:[#allocation5 + $0xb4] sm:$0xf0] (%p628_p7) }
 0x3e1   : >> { %v1332_v57 = vsel %vm1324_vm9, %v1320_v15, %v1328_v52   ;;  %v1296_v8 = vadd.f32 %v1295_v33, %v1277_v54  ;;  %v2248_v15 = vor.u32 (%p628_p7), %v2416_v46, %v2245_v50  ;;  %v2269_v33 = vld [vmem:[#allocation5 + $0xb0] sm:$0xf] (%p628_p7)  ;;  %v2243_v52 = vld [vmem:[#allocation5 + $0x80] sm:$0xf] (%p628_p7)  ;;  %v2288_v50 = vor.u32 (%p628_p7), %v2427_v26, %v2287_v38 }
 0x3e2   : >> { %v1297_v48 = vpop.f32.mrf.mxu2  ;;  %v1336_v58 = vpack.c.bf16 (%p628_p7), %v1332_v57, %v1331_v44  ;;  %v2270_v54 = vor.u32 (%p628_p7), %v2423_v51, %v2269_v33  ;;  %v2281_v33 = vld [vmem:[#allocation5 + $0xc8] sm:$0xf0] (%p628_p7)  ;;  %v2279_v51 = vld [vmem:[#allocation5 + $0xc0] sm:$0xf] (%p628_p7) }
 0x3e3   : >> { %v1315_v60 = vadd.f32 %v1314_v56, %v1296_v8  ;;  %v3353_v8 = vmov %v1331_v44  ;;  %v2203_v44 = vld [vmem:[#allocation5 + $0x38] sm:$0xf0] (%p628_p7)  ;;  %1572 = vmatpush.bf16.msrb.mxu2 (%p628_p7), %v2248_v15  ;;  %v2417_v56 = vld [vmem:[#allocation5 + $0x84] sm:$0xf0] (%p628_p7)  ;;  %v2424_v15 = vld [vmem:[#allocation5 + $0xc4] sm:$0xf] (%p628_p7) }
 0x3e4   : > { %v2206_v45 = vor.u32 (%p628_p7), %v2406_v42, %v2203_v44  ;;  %v2237_v8 = vld [vmem:[#allocation5 + $0x78] sm:$0xf0] (%p628_p7)  ;;  %1632 = vmatpush.bf16.msrb.mxu3 (%p628_p7), %v2270_v54  ;;  %v2432_v44 = vld [vmem:[#allocation5 + $0x104] sm:$0xf] (%p628_p7)  ;;  %v2314_v54 = vor.u32 (%p628_p7), %v2433_v63, %v2313_v41 }
 0x3e5   : >> { %v1321_v2 = vadd.f32 %v2662_v9, %v1315_v60  ;;  %v2244_v60 = vor.u32 (%p628_p7), %v2417_v56, %v2243_v52  ;;  %v2425_v52 = vld [vmem:[#allocation5 + $0xc4] sm:$0xf0] (%p628_p7) }
 0x3e6   : >> { %v1278_v30 = vpop.f32.mrf.mxu3 }
 0x3e7   : >> { %vm1325_vm13 = vcmp.gt.f32.partialorder %v1321_v2, 0.0  ;;  %v1329_v4 = vmul.f32 0.01, %v1321_v2  ;;  %v1279_v47 = vadd.f32 %v1278_v30, %v1224_v27  ;;  %v2422_v27 = vld [vmem:[#allocation5 + $0xb4] sm:$0xf] (%p628_p7)  ;;  %1559 = vmatpush.bf16.msrb.mxu1 (%p628_p7), %v2244_v60 }
 0x3e8   : > { %v2271_v30 = vld [vmem:[#allocation5 + $0xb8] sm:$0xf0] (%p628_p7)  ;;  %v2430_v60 = vld [vmem:[#allocation5 + $0xf4] sm:$0xf] (%p628_p7) }
 0x3e9   : >> { %v1333_v43 = vsel %vm1325_vm13, %v1321_v2, %v1329_v4   ;;  %v1298_v17 = vadd.f32 %v1297_v48, %v1279_v47  ;;  %v2235_v4 = vld [vmem:[#allocation5 + $0x70] sm:$0xf] (%p628_p7)  ;;  %v2274_v47 = vor.u32 (%p628_p7), %v2422_v27, %v2271_v30  ;;  %v2415_v48 = vld [vmem:[#allocation5 + $0x74] sm:$0xf0] (%p628_p7)  ;;  %v2284_v27 = vor.u32 (%p628_p7), %v2424_v15, %v2281_v33 }
 0x3ea   : >> { %v3351_v9 = vmov %v1333_v43  ;;  %v2280_v30 = vor.u32 (%p628_p7), %v2425_v52, %v2279_v51 }
 0x3eb   : >> { %v1317_v49 = vadd.f32 %v1316_v19, %v1298_v17  ;;  %v3352_v19 = vmov %v1332_v57  ;;  %v2219_v9 = vld [vmem:[#allocation5 + $0x58] sm:$0xf0] (%p628_p7)  ;;  %v2414_v57 = vld [vmem:[#allocation5 + $0x74] sm:$0xf] (%p628_p7)  ;;  %v2421_v17 = vld [vmem:[#allocation5 + $0xa4] sm:$0xf0] (%p628_p7) }
 0x3ec   : > { %v2222_v5 = vor.u32 (%p628_p7), %v2410_v21, %v2219_v9  ;;  %v2240_v2 = vor.u32 (%p628_p7), %v2414_v57, %v2237_v8  ;;  %v2236_v19 = vor.u32 (%p628_p7), %v2415_v48, %v2235_v4  ;;  %v2258_v21 = vor.u32 (%p628_p7), %v2418_v13, %v2255_v59  ;;  %v2305_v57 = vld [vmem:[#allocation5 + $0xf0] sm:$0xf] (%p628_p7)  ;;  %v2431_v8 = vld [vmem:[#allocation5 + $0xf4] sm:$0xf0] (%p628_p7)  ;;  %v2440_v48 = vld [vmem:[#allocation5 + $0x144] sm:$0xf] (%p628_p7) }
 0x3ed   : >> { %v1322_v62 = vadd.f32 %v2658_v18, %v1317_v49  ;;  %v2306_v4 = vor.u32 (%p628_p7), %v2431_v8, %v2305_v57 }
 0x3ee   : > { %630 = sbr.rel (!%p628_p7) target bundleno = 309 (0x135), region = 133  ;;  %1573 = vmatpush.bf16.msrb.mxu2 (%p628_p7), %v2240_v2  ;;  %1560 = vmatpush.bf16.msrb.mxu1 (%p628_p7), %v2236_v19  ;;  %v2307_v2 = vld [vmem:[#allocation5 + $0xf8] sm:$0xf0] (%p628_p7)  ;;  %v2441_v19 = vld [vmem:[#allocation5 + $0x144] sm:$0xf0] (%p628_p7) }
 0x3ef   : >> { %vm1326_vm14 = vcmp.gt.f32.partialorder %v1322_v62, 0.0  ;;  %v1330_v0 = vmul.f32 0.01, %v1322_v62 }
 0x3f1   : >> { %v1334_v6 = vsel %vm1326_vm14, %v1322_v62, %v1330_v0   ;;  %v2412_v62 = vld [vmem:[#allocation5 + $0x64] sm:$0xf] (%p628_p7)  ;;  %v2229_v0 = vld [vmem:[#allocation5 + $0x68] sm:$0xf0] (%p628_p7) }
 0x3f2   : >> { %v3350_v18 = vmov %v1334_v6  ;;  %v1337_v7 = vpack.c.bf16 (%p628_p7), %v1334_v6, %v1333_v43  ;;  %v2261_v43 = vld [vmem:[#allocation5 + $0xa0] sm:$0xf] (%p628_p7)  ;;  %v2420_v6 = vld [vmem:[#allocation5 + $0xa4] sm:$0xf] (%p628_p7)  ;;  %1561 = vmatpush.bf16.msrb.mxu1 (%p628_p7), %v2228_v16 }
 0x3f3   : > { %v1335_v18 = vld [vmem:[%s3342_s6] sm:$0xf]  ;;  %v2262_v49 = vor.u32 %v2421_v17, %v2261_v43  ;;  %v2266_v20 = vor.u32 %v2420_v6, %v2263_v10  ;;  %v2349_v43 = vld [vmem:[#allocation5 + $0x148] sm:$0xf0] }
 0x3f4   : > { %1354 = vmatpush.bf16.msra.mxu0 %v1337_v7  ;;  %v2232_v7 = vor.u32 %v2412_v62, %v2229_v0  ;;  %v2347_v17 = vld [vmem:[#allocation5 + $0x140] sm:$0xf]  ;;  %v2447_v62 = vld [vmem:[#allocation5 + $0x174] sm:$0xf0]  ;;  %v2446_v0 = vld [vmem:[#allocation5 + $0x174] sm:$0xf]  ;;  %v2352_v10 = vor.u32 %v2440_v48, %v2349_v43 }
 0x3f5   : > { %1633 = vmatpush.bf16.msrb.mxu3 %v2262_v49  ;;  %v2373_v49 = vld [vmem:[#allocation5 + $0x170] sm:$0xf]  ;;  %v2375_v6 = vld [vmem:[#allocation5 + $0x178] sm:$0xf0]  ;;  %v2348_v11 = vor.u32 %v2441_v19, %v2347_v17  ;;  %v2365_v16 = vld [vmem:[#allocation5 + $0x160] sm:$0xf] }
 0x3f6   : > { %1574 = vmatpush.bf16.msrb.mxu2 %v2232_v7  ;;  %v2378_v59 = vor.u32 %v2446_v0, %v2375_v6 }
 0x3f8   : > { %1355 = vmatpush.bf16.msra.mxu0 %v1336_v58  ;;  %v2419_v58 = vld [vmem:[#allocation5 + $0x94] sm:$0xf0] }
 0x3f9   : > { %v2254_v14 = vor.u32 %v2419_v58, %v2253_v12  ;;  %v2339_v12 = vld [vmem:[#allocation5 + $0x130] sm:$0xf]  ;;  %v2439_v58 = vld [vmem:[#allocation5 + $0x134] sm:$0xf0] }
 0x3fb   : > { %2172 = vmatmul.msk.bf16.vlgmr.msra.gmra.mxu0 %vm926_vm12, %v1335_v18  ;;  %1634 = vmatpush.bf16.msrb.mxu3 %v2254_v14  ;;  %v2428_v18 = vld [vmem:[#allocation5 + $0xe4] sm:$0xf]  ;;  %v2374_v14 = vor.u32 %v2447_v62, %v2373_v49 }
 0x3fc   : > { %1498 = vmatpush.bf16.msrb.mxu0 %v2222_v5  ;;  %v2300_v1 = vor.u32 %v2428_v18, %v2297_v23  ;;  %v2340_v18 = vor.u32 %v2439_v58, %v2339_v12  ;;  %v2436_v23 = vld [vmem:[#allocation5 + $0x124] sm:$0xf] }
 0x400   : > { %1499 = vmatpush.bf16.msrb.mxu0 %v2214_v35  ;;  %v2426_v35 = vld [vmem:[#allocation5 + $0xd4] sm:$0xf] }
 0x401   : > { %v2292_v46 = vor.u32 %v2426_v35, %v2289_v37  ;;  %v2358_v37 = vor.u32 %v2443_v53, %v2357_v32 }
 0x404   : > { %1500 = vmatpush.bf16.msrb.mxu0 %v2206_v45  ;;  %v2315_v45 = vld [vmem:[#allocation5 + $0x108] sm:$0xf0] }
 0x405   : > { %v2318_v56 = vor.u32 %v2432_v44, %v2315_v45 }
 0x408   : > { %1645 = vmatpush.bf16.msra.mxu0 %v2274_v47  ;;  %v2310_v47 = vor.u32 %v2430_v60, %v2307_v2 }
 0x40c   : > { %1646 = vmatpush.bf16.msra.mxu0 %v2266_v20  ;;  %v2341_v20 = vld [vmem:[#allocation5 + $0x138] sm:$0xf0] }
 0x410   : > { %1647 = vmatpush.bf16.msra.mxu0 %v2258_v21  ;;  %v2445_v21 = vld [vmem:[#allocation5 + $0x164] sm:$0xf0] }
 0x411   : > { %v2366_v28 = vor.u32 %v2445_v21, %v2365_v16 }
 0x478   : > { %v1357_v9 = vpop.f32.mrf.mxu0 }
 0x479   : > { %v1358_v5 = vadd.f32 %v1357_v9, %v1342_v22  ;;  %v2444_v22 = vld [vmem:[#allocation5 + $0x164] sm:$0xf]  ;;  %v2367_v9 = vld [vmem:[#allocation5 + $0x168] sm:$0xf0] }
 0x47a   : > { %v2370_v31 = vor.u32 %v2444_v22, %v2367_v9 }
 0x47b   : > { %vm1361_vm0 = vcmp.gt.f32.partialorder %v1358_v5, 0.0  ;;  %v1362_v25 = vmul.f32 0.01, %v1358_v5 }
 0x47d   : > { %v1363_v61 = vsel %vm1361_vm0, %v1358_v5, %v1362_v25  ;;  %v2344_v5 = vor.u32 %v2438_v3, %v2341_v20  ;;  %v2437_v25 = vld [vmem:[#allocation5 + $0x124] sm:$0xf0] }
 0x47e   : > { %v3281_v36 = vpack.c.bf16 %v1363_v61, %v1363_v61  ;;  %v2442_v61 = vld [vmem:[#allocation5 + $0x154] sm:$0xf]  ;;  %v2332_v35 = vor.u32 %v2437_v25, %v2331_v24 }
 0x480   : > { %v1359_v42 = vpop.f32.mrf.mxu0  ;;  %2197 = vmatmul.msk.bf16.vlgmr.msra.gmra.mxu1 %vm1402_vm1, %v3281_v36  ;;  %2198 = vmatmul.msk.bf16.vlgmr.msra.gmra.mxu2 %vm1402_vm1, %v3281_v36  ;;  %v3288_v29 = vshrl.u32 %v3281_v36, 16  ;;  %v1520_v7 = vrot.slane %v3281_v36, 1  ;;  %v1666_v26 = vrot.slane %v3281_v36, 2 }
 0x481   : > { %1718 = vmatpush.bf16.msra.mxu2 %v2300_v1  ;;  %1705 = vmatpush.bf16.msra.mxu1 %v2296_v34  ;;  %v2359_v1 = vld [vmem:[#allocation5 + $0x158] sm:$0xf0]  ;;  %v2336_v34 = vor.u32 %v2436_v23, %v2333_v55 }
 0x482   : > { %2223 = vmatmul.msk.bf16.vlgmr.msra.gmra.mxu3 %vm1402_vm1, %v3288_v29  ;;  %2224 = vmatmul.msk.bf16.vlgmr.msrb.gmra.mxu0 %vm1402_vm1, %v3288_v29  ;;  %v1593_v13 = vrot.slane %v3288_v29, 1  ;;  %v2362_v38 = vor.u32 %v2442_v61, %v2359_v1  ;;  %v1885_v41 = vrot.slane %v3288_v29, 3 }
 0x483   : > { %1778 = vmatpush.bf16.msra.mxu3 %v2322_v39  ;;  %1791 = vmatpush.bf16.msrb.mxu0 %v2326_v40  ;;  %v1739_v39 = vrot.slane %v3288_v29, 2  ;;  %v1812_v40 = vrot.slane %v3281_v36, 3 }
 0x485   : > { %1719 = vmatpush.bf16.msra.mxu2 %v2292_v46  ;;  %1706 = vmatpush.bf16.msra.mxu1 %v2288_v50 }
 0x487   : > { %1779 = vmatpush.bf16.msra.mxu3 %v2314_v54  ;;  %1792 = vmatpush.bf16.msrb.mxu0 %v2318_v56 }
 0x489   : > { %1720 = vmatpush.bf16.msra.mxu2 %v2284_v27  ;;  %1707 = vmatpush.bf16.msra.mxu1 %v2280_v30 }
 0x48b   : > { %1780 = vmatpush.bf16.msra.mxu3 %v2306_v4  ;;  %1793 = vmatpush.bf16.msrb.mxu0 %v2310_v47  ;;  %v1364_v4 = vld [vmem:[%s3345_s9] sm:$0x3] }
 0x490   : > { %2249 = vmatmul.msk.bf16.vlgmr.msrb.gmra.mxu1 %vm1402_vm1, %v1520_v7  ;;  %2250 = vmatmul.msk.bf16.vlgmr.msrb.gmra.mxu2 %vm1402_vm1, %v1520_v7 }
 0x491   : > { %1864 = vmatpush.bf16.msrb.mxu2 %v2352_v10  ;;  %1851 = vmatpush.bf16.msrb.mxu1 %v2348_v11 }
 0x492   : > { %2275 = vmatmul.msk.bf16.vlgmr.msrb.gmra.mxu3 %vm1402_vm1, %v1593_v13  ;;  %2276 = vmatmul.msk.bf16.vlgmr.msra.gmra.mxu0 %vm1402_vm1, %v1593_v13 }
 0x493   : > { %1924 = vmatpush.bf16.msrb.mxu3 %v2374_v14  ;;  %1937 = vmatpush.bf16.msra.mxu0 %v2378_v59 }
 0x495   : > { %1865 = vmatpush.bf16.msrb.mxu2 %v2344_v5  ;;  %1852 = vmatpush.bf16.msrb.mxu1 %v2340_v18 }
 0x497   : > { %1925 = vmatpush.bf16.msrb.mxu3 %v2366_v28  ;;  %1938 = vmatpush.bf16.msra.mxu0 %v2370_v31 }
 0x499   : > { %1866 = vmatpush.bf16.msrb.mxu2 %v2336_v34  ;;  %1853 = vmatpush.bf16.msrb.mxu1 %v2332_v35  ;;  %v1954_v35 = vld [vmem:[%s3346_s10] sm:$0x3] }
 0x49b   : > { %1926 = vmatpush.bf16.msrb.mxu3 %v2358_v37  ;;  %1939 = vmatpush.bf16.msra.mxu0 %v2362_v38 }
 0x4a0   : > { %2301 = vmatmul.msk.bf16.vlgmr.msra.gmra.mxu1 %vm1402_vm1, %v1666_v26  ;;  %2302 = vmatmul.msk.bf16.vlgmr.msra.gmra.mxu2 %vm1402_vm1, %v1666_v26 }
 0x4a2   : > { %2327 = vmatmul.msk.bf16.vlgmr.msra.gmra.mxu3 %vm1402_vm1, %v1739_v39  ;;  %2328 = vmatmul.msk.bf16.vlgmr.msrb.gmra.mxu0 %vm1402_vm1, %v1739_v39 }
 0x4b0   : > { %2353 = vmatmul.msk.bf16.vlgmr.msrb.gmra.mxu1 %vm1402_vm1, %v1812_v40  ;;  %2354 = vmatmul.msk.bf16.vlgmr.msrb.gmra.mxu2 %vm1402_vm1, %v1812_v40 }
 0x4b2   : > { %2379 = vmatmul.msk.bf16.vlgmr.msrb.gmra.mxu3 %vm1402_vm1, %v1885_v41  ;;  %2380 = vmatmul.msk.bf16.vlgmr.msra.gmra.mxu0 %vm1402_vm1, %v1885_v41 }
 0x4fd   : > { %v1415_v63 = vpop.f32.mrf.mxu1 }
 0x4ff   : > { %v1502_v42 = vpop.f32.mrf.mxu0 }
 0x500   : > { %v1508_v49 = vrot.slane %v1502_v42, 7 }
 0x503   : > { %v1428_v44 = vpop.f32.mrf.mxu2 }
 0x504   : > { %v1434_v2 = vrot.slane %v1428_v44, 7  ;;  %v1966_v44 = vld [vmem:[#allocation2] sm:$0x1] }
 0x505   : > { %v1417_v45 = vpop.f32.mrf.mxu1  ;;  %v1489_v46 = vpop.f32.mrf.mxu3 }
 0x506   : > { %v1435_v30 = vsel %vm539_vm6, %v1415_v63, %v1434_v2  ;;  %v1509_v0 = vsel %vm539_vm6, %v1489_v46, %v1508_v49 }
 0x507   : > { %v1504_v50 = vpop.f32.mrf.mxu0  ;;  %v1437_v43 = vadd.f32 %v1435_v30, %v1364_v4 }
 0x509   : > { %v1511_v7 = vadd.f32 %v1509_v0, %v1437_v43 }
 0x50b   : > { %v1430_v15 = vpop.f32.mrf.mxu2 }
 0x50d   : > { %v1491_v33 = vpop.f32.mrf.mxu3  ;;  %v1563_v51 = vpop.f32.mrf.mxu1 }
 0x50f   : > { %v1649_v36 = vpop.f32.mrf.mxu0 }
 0x510   : > { %v1655_v20 = vrot.slane %v1649_v36, 7 }
 0x513   : > { %v1576_v52 = vpop.f32.mrf.mxu2 }
 0x514   : > { %v1582_v48 = vrot.slane %v1576_v52, 7 }
 0x515   : > { %v1565_v54 = vpop.f32.mrf.mxu1  ;;  %v1636_v56 = vpop.f32.mrf.mxu3 }
 0x516   : > { %v1583_v6 = vsel %vm539_vm6, %v1563_v51, %v1582_v48  ;;  %v1656_v13 = vsel %vm539_vm6, %v1636_v56, %v1655_v20 }
 0x517   : > { %v1651_v57 = vpop.f32.mrf.mxu0  ;;  %v1585_v11 = vadd.f32 %v1583_v6, %v1511_v7 }
 0x519   : > { %v1658_v59 = vadd.f32 %v1656_v13, %v1585_v11 }
 0x51b   : > { %v1578_v8 = vpop.f32.mrf.mxu2 }
 0x51d   : > { %v1638_v29 = vpop.f32.mrf.mxu3  ;;  %v1709_v60 = vpop.f32.mrf.mxu1 }
 0x51f   : > { %v1795_v27 = vpop.f32.mrf.mxu0 }
 0x520   : > { %v1801_v22 = vrot.slane %v1795_v27, 7 }
 0x523   : > { %v1722_v47 = vpop.f32.mrf.mxu2 }
 0x524   : > { %v1728_v10 = vrot.slane %v1722_v47, 7 }
 0x525   : > { %v1711_v17 = vpop.f32.mrf.mxu1  ;;  %v1782_v19 = vpop.f32.mrf.mxu3 }
 0x526   : > { %v1729_v14 = vsel %vm539_vm6, %v1709_v60, %v1728_v10  ;;  %v1802_v5 = vsel %vm539_vm6, %v1782_v19, %v1801_v22 }
 0x527   : > { %v1797_v62 = vpop.f32.mrf.mxu0  ;;  %v1731_v21 = vadd.f32 %v1729_v14, %v1658_v59 }
 0x529   : > { %v1804_v23 = vadd.f32 %v1802_v5, %v1731_v21 }
 0x52b   : > { %v1724_v3 = vpop.f32.mrf.mxu2 }
 0x52d   : > { %v1784_v12 = vpop.f32.mrf.mxu3  ;;  %v1855_v58 = vpop.f32.mrf.mxu1 }
 0x52f   : > { %v1941_v16 = vpop.f32.mrf.mxu0 }
 0x530   : > { %v1947_v25 = vrot.slane %v1941_v16, 7 }
 0x533   : > { %v1868_v9 = vpop.f32.mrf.mxu2 }
 0x534   : > { %v1874_v18 = vrot.slane %v1868_v9, 7 }
 0x535   : > { %v1857_v55 = vpop.f32.mrf.mxu1  ;;  %v1928_v24 = vpop.f32.mrf.mxu3 }
 0x536   : > { %v1875_v28 = vsel %vm539_vm6, %v1855_v58, %v1874_v18  ;;  %v1948_v53 = vsel %vm539_vm6, %v1928_v24, %v1947_v25 }
 0x537   : > { %v1877_v31 = vadd.f32 %v1875_v28, %v1804_v23  ;;  %v1943_v32 = vpop.f32.mrf.mxu0 }
 0x539   : > { %v1950_v61 = vadd.f32 %v1948_v53, %v1877_v31 }
 0x53b   : > { %vm1951_vm2 = vcmp.gt.f32.partialorder %v1950_v61, 0.0  ;;  %v1952_v1 = vmul.f32 0.01, %v1950_v61  ;;  %v1870_v34 = vpop.f32.mrf.mxu2 }
 0x53d   : > { %v1930_v37 = vpop.f32.mrf.mxu3  ;;  %v1953_v38 = vsel %vm1951_vm2, %v1950_v61, %v1952_v1 }
 0x53e   : > { %v1955_v26 = vmul.f32 %v1954_v35, %v1953_v38 }
 0x540   : > { %v1957_v39 = vperm.slane %v1955_v26, 0  ;;  %v1958_v40 = vperm.slane %v1955_v26, 1 }
 0x542   : > { %v1961_v41 = vsel %vm539_vm6, %v1957_v39, 0.0  ;;  %v1962_v63 = vsel %vm539_vm6, %v1958_v40, 0.0 }
 0x543   : > { %v1963_v42 = vadd.f32 %v1962_v63, %v1961_v41 }
 0x545   : > { %1964 = vadd.xlane.f32.xlu0 %v1963_v42 }
 0x5b8   : > { %v1965_v45 = vpop.xlane.xlu0 %1964 }
 0x5b9   : > { %v1967_v46 = vadd.f32 %v1966_v44, %v1965_v45 }
 0x5bb   : > { %1969 = vst.msk [vmem:[%s439_s11] sm:$0x1] %vm1968_vm3, %v1967_v46 }
 0x5bc PF: > { %s26_s23 = sadd.s32 1, %s2654_s23  }
 0x5bd   : > { %p23_p8 = scmp.ge.s32.totalorder %s26_s23, 4  }
 0x5bf   :  { %25 = sbr.rel (!%p23_p8) target bundleno = 5 (0x5), region = 144 }
 0x5c4   :  { %1987 = vsyncpa [#allocation4], 1 }
 0x5c5   :  { %1989 = vsyncpa [#allocation4 + $0x1], 1 }
 0x5c6   :  { %1990 = vsyncpa [#allocation6], 1 }

</bundles_post_ra>
